<compile_context>
chip_gen: v7x
topology: tpu7x:2x2x1
jax: 0.10.0
libtpu: 0.0.40
codegen_flags: <defaults>
</compile_context>

<pallas_src>
import jax
import jax.numpy as jnp
from jax.experimental import pallas as pl
from jax.experimental.pallas import tpu as pltpu

# ----- small, deterministic hyper-parameters (consistent with TextRNN.forward) -----
VOCAB = 64
EMBED = 32
HIDDEN = 32
NUM_LAYERS = 2          # fixed at 2 (matches module default)
OUT = 8
BATCH = 2
SEQ = 8
BATCH_PAD = 8           # pad batch to the f32 sublane count (free throughput)


def _run_direction(gates_in, whh_bf16, seq, bs, hidden, reverse):
    """Serial LSTM recurrence for one direction.

    gates_in: (S*B, 4H) f32, already x @ W_ih + (b_ih + b_hh)
    whh_bf16: (H, 4H) bf16 recurrent weights (MXU-native dtype)
    Returns python list of (B, H) hidden states, index-aligned to t.
    """
    h = jnp.zeros((bs, hidden), jnp.float32)
    c = jnp.zeros((bs, hidden), jnp.float32)
    outs = [None] * seq
    ts = range(seq - 1, -1, -1) if reverse else range(seq)
    for t in ts:
        gi = gates_in[t * bs:(t + 1) * bs, :]                      # static slice
        gates = gi + jnp.dot(h.astype(jnp.bfloat16), whh_bf16,
                             preferred_element_type=jnp.float32)
        # 2 EUP pushes on the full 128-lane vreg (PyTorch gate order i,f,g,o)
        sig = jax.nn.sigmoid(gates)
        th = jnp.tanh(gates)
        i_g = sig[:, 0 * hidden:1 * hidden]
        f_g = sig[:, 1 * hidden:2 * hidden]
        g_g = th[:, 2 * hidden:3 * hidden]
        o_g = sig[:, 3 * hidden:4 * hidden]
        c = f_g * c + i_g * g_g
        h = o_g * jnp.tanh(c)
        outs[t] = h
    return outs


def _bidir_layer(x2d, wih_ref, whh_ref, b_ref, seq, bs, hidden):
    """One bidirectional LSTM layer over the whole (time-major, flattened) sequence.

    x2d: (S*B, in) f32.  Returns (S*B, 2H) f32 (fwd || bwd, PyTorch convention).
    """
    # Hoisted input projections + folded bias (one MXU pass per direction).
    gi_f = jnp.dot(x2d, wih_ref[0], preferred_element_type=jnp.float32) + b_ref[0]
    gi_b = jnp.dot(x2d, wih_ref[1], preferred_element_type=jnp.float32) + b_ref[1]

    fwd = _run_direction(gi_f, whh_ref[0], seq, bs, hidden, reverse=False)
    bwd = _run_direction(gi_b, whh_ref[1], seq, bs, hidden, reverse=True)

    fwd_all = jnp.concatenate(fwd, axis=0)          # (S*B, H)
    bwd_all = jnp.concatenate(bwd, axis=0)          # (S*B, H), aligned to t
    return jnp.concatenate([fwd_all, bwd_all], axis=-1)   # (S*B, 2H)


def textrnn_kernel(x_ref,
                   wih0_ref, whh0_ref, b0_ref,
                   wih1_ref, whh1_ref, b1_ref,
                   fcw_ref, fcb_ref,
                   out_ref):
    """Whole TextRNN forward (post-embedding) in one kernel invocation.

    x_ref: (S*B, E) time-major flattened embeddings.
    """
    x2d = x_ref[...]

    # layer 0: input = EMBED
    y0 = _bidir_layer(x2d, wih0_ref, whh0_ref, b0_ref, SEQ, BATCH_PAD, HIDDEN)
    # inter-layer dropout is identity at inference
    # layer 1: input = 2*HIDDEN
    y1 = _bidir_layer(y0, wih1_ref, whh1_ref, b1_ref, SEQ, BATCH_PAD, HIDDEN)

    # hiddens[:, -1, :]  ->  Linear(2H -> OUT)
    last = y1[(SEQ - 1) * BATCH_PAD:SEQ * BATCH_PAD, :]            # (B, 2H)
    out_ref[...] = (jnp.dot(last, fcw_ref[...],
                            preferred_element_type=jnp.float32)
                    + fcb_ref[...])


def init_params(key):
    """Deterministic synthetic parameters (PyTorch-style uniform init)."""
    keys = jax.random.split(key, 12)
    scale = 1.0 / float(jnp.sqrt(jnp.float32(HIDDEN)))

    def u(k, shape):
        return jax.random.uniform(k, shape, jnp.float32, -scale, scale)

    emb = 0.1 * jax.random.normal(keys[0], (VOCAB, EMBED), jnp.float32)
    emb = emb.at[0].set(0.0)                                # padding_idx=0

    params = {
        "embedding": emb,
        # layer 0 (input = EMBED), dirs stacked on axis 0, weights pre-transposed
        "wih0_T": u(keys[1], (2, EMBED, 4 * HIDDEN)),
        "whh0_T": u(keys[2], (2, HIDDEN, 4 * HIDDEN)),
        "b0": u(keys[3], (2, 1, 4 * HIDDEN)) + u(keys[4], (2, 1, 4 * HIDDEN)),
        # layer 1 (input = 2*HIDDEN)
        "wih1_T": u(keys[5], (2, 2 * HIDDEN, 4 * HIDDEN)),
        "whh1_T": u(keys[6], (2, HIDDEN, 4 * HIDDEN)),
        "b1": u(keys[7], (2, 1, 4 * HIDDEN)) + u(keys[8], (2, 1, 4 * HIDDEN)),
        # fc: Linear(2H -> OUT), weight pre-transposed
        "fcw_T": u(keys[9], (2 * HIDDEN, OUT)),
        "fcb": u(keys[10], (1, OUT)),
    }
    return params


def textrnn_forward(token_ids, params):
    bs = token_ids.shape[0]

    # embedding lookup (gather) is glue, done in plain JAX
    emb = params["embedding"][token_ids].astype(jnp.float32)       # (B, S, E)
    # dropout after embedding is identity in eval/inference mode

    # Pad batch to the f32 sublane count, then go time-major + flatten so every
    # per-timestep access in the kernel is a static sublane-aligned row block.
    emb = jnp.pad(emb, ((0, BATCH_PAD - bs), (0, 0), (0, 0)))      # (Bp, S, E)
    x2d = jnp.transpose(emb, (1, 0, 2)).reshape(SEQ * BATCH_PAD, EMBED)

    # Recurrent weights in bf16 (MXU-native); f32 accumulation inside kernel.
    whh0_bf16 = params["whh0_T"].astype(jnp.bfloat16)
    whh1_bf16 = params["whh1_T"].astype(jnp.bfloat16)

    vmem = pl.BlockSpec(memory_space=pltpu.MemorySpace.VMEM)
    args = (x2d,
            params["wih0_T"], whh0_bf16, params["b0"],
            params["wih1_T"], whh1_bf16, params["b1"],
            params["fcw_T"], params["fcb"])

    out_padded = pl.pallas_call(
        textrnn_kernel,
        out_shape=jax.ShapeDtypeStruct((BATCH_PAD, OUT), jnp.float32),
        in_specs=[vmem] * len(args),
        out_specs=vmem,
    )(*args)

    return out_padded[:bs]


if __name__ == "__main__":
    key = jax.random.PRNGKey(0)
    k_tok, k_par = jax.random.split(key)

    token_ids = jax.random.randint(k_tok, (BATCH, SEQ), 0, VOCAB, dtype=jnp.int32)
    params = init_params(k_par)

    logits = textrnn_forward(token_ids, params)
    logits = jax.block_until_ready(logits)

    assert logits.shape == (BATCH, OUT)
    assert bool(jnp.all(jnp.isfinite(logits)))
    print("KERNEL_OK")
</pallas_src>

<mosaic_0001>
module attributes {stable_mosaic.version = 11 : i64} {
  func.func @textrnn_kernel(%arg0: memref<64x32xf32, #tpu.memory_space<vmem>>, %arg1: memref<2x32x128xf32, #tpu.memory_space<vmem>>, %arg2: memref<2x32x128xbf16, #tpu.memory_space<vmem>>, %arg3: memref<2x1x128xf32, #tpu.memory_space<vmem>>, %arg4: memref<2x64x128xf32, #tpu.memory_space<vmem>>, %arg5: memref<2x32x128xbf16, #tpu.memory_space<vmem>>, %arg6: memref<2x1x128xf32, #tpu.memory_space<vmem>>, %arg7: memref<64x8xf32, #tpu.memory_space<vmem>>, %arg8: memref<1x8xf32, #tpu.memory_space<vmem>>, %arg9: memref<8x8xf32, #tpu.memory_space<vmem>>) attributes {dimension_semantics = [], scalar_prefetch = 0 : i64, scratch_operands = 0 : i64, tpu.core_type = #tpu.core_type<tc>} {
    %c0 = arith.constant 0 : index
    %c0_0 = arith.constant 0 : index
    %0 = vector.load %arg0[%c0, %c0_0] : memref<64x32xf32, #tpu.memory_space<vmem>>, vector<64x32xf32>
    %c0_1 = arith.constant 0 : index
    %c0_2 = arith.constant 0 : index
    %c0_3 = arith.constant 0 : index
    %1 = vector.load %arg1[%c0_1, %c0_2, %c0_3] : memref<2x32x128xf32, #tpu.memory_space<vmem>>, vector<1x32x128xf32>
    %2 = vector.shape_cast %1 : vector<1x32x128xf32> to vector<32x128xf32>
    %cst = arith.constant dense<0.000000e+00> : vector<64x128xf32>
    %3 = tpu.matmul %0, %2, %cst {dimension_numbers = #tpu.dot_dimension_numbers<[1], [0], [0], [1], [0, 0, 1, 1], [], []>} : vector<64x32xf32>, vector<32x128xf32>, vector<64x128xf32> -> vector<64x128xf32>
    %c0_4 = arith.constant 0 : index
    %c0_5 = arith.constant 0 : index
    %c0_6 = arith.constant 0 : index
    %4 = vector.load %arg3[%c0_4, %c0_5, %c0_6] : memref<2x1x128xf32, #tpu.memory_space<vmem>>, vector<1x1x128xf32>
    %5 = vector.shape_cast %4 : vector<1x1x128xf32> to vector<1x128xf32>
    %6 = vector.broadcast %5 : vector<1x128xf32> to vector<64x128xf32>
    %7 = arith.addf %3, %6 : vector<64x128xf32>
    %c1 = arith.constant 1 : index
    %c0_7 = arith.constant 0 : index
    %c0_8 = arith.constant 0 : index
    %8 = vector.load %arg1[%c1, %c0_7, %c0_8] : memref<2x32x128xf32, #tpu.memory_space<vmem>>, vector<1x32x128xf32>
    %9 = vector.shape_cast %8 : vector<1x32x128xf32> to vector<32x128xf32>
    %cst_9 = arith.constant dense<0.000000e+00> : vector<64x128xf32>
    %10 = tpu.matmul %0, %9, %cst_9 {dimension_numbers = #tpu.dot_dimension_numbers<[1], [0], [0], [1], [0, 0, 1, 1], [], []>} : vector<64x32xf32>, vector<32x128xf32>, vector<64x128xf32> -> vector<64x128xf32>
    %c1_10 = arith.constant 1 : index
    %c0_11 = arith.constant 0 : index
    %c0_12 = arith.constant 0 : index
    %11 = vector.load %arg3[%c1_10, %c0_11, %c0_12] : memref<2x1x128xf32, #tpu.memory_space<vmem>>, vector<1x1x128xf32>
    %12 = vector.shape_cast %11 : vector<1x1x128xf32> to vector<1x128xf32>
    %13 = vector.broadcast %12 : vector<1x128xf32> to vector<64x128xf32>
    %14 = arith.addf %10, %13 : vector<64x128xf32>
    %c0_13 = arith.constant 0 : index
    %c0_14 = arith.constant 0 : index
    %c0_15 = arith.constant 0 : index
    %15 = vector.load %arg2[%c0_13, %c0_14, %c0_15] : memref<2x32x128xbf16, #tpu.memory_space<vmem>>, vector<1x32x128xbf16>
    %16 = vector.shape_cast %15 : vector<1x32x128xbf16> to vector<32x128xbf16>
    %cst_16 = arith.constant 0.000000e+00 : f32
    %17 = vector.broadcast %cst_16 : f32 to vector<8x32xf32>
    %cst_17 = arith.constant 0.000000e+00 : f32
    %18 = vector.broadcast %cst_17 : f32 to vector<8x32xf32>
    %19 = vector.extract_strided_slice %7 {offsets = [0, 0], sizes = [8, 128], strides = [1, 1]} : vector<64x128xf32> to vector<8x128xf32>
    %20 = arith.truncf %17 : vector<8x32xf32> to vector<8x32xbf16>
    %cst_18 = arith.constant dense<0.000000e+00> : vector<8x128xf32>
    %21 = tpu.matmul %20, %16, %cst_18 {dimension_numbers = #tpu.dot_dimension_numbers<[1], [0], [0], [1], [0, 0, 1, 1], [], []>} : vector<8x32xbf16>, vector<32x128xbf16>, vector<8x128xf32> -> vector<8x128xf32>
    %22 = arith.addf %19, %21 : vector<8x128xf32>
    %23 = arith.negf %22 : vector<8x128xf32>
    %24 = math.exp %23 : vector<8x128xf32>
    %cst_19 = arith.constant 1.000000e+00 : f32
    %25 = vector.broadcast %cst_19 : f32 to vector<8x128xf32>
    %26 = arith.addf %25, %24 : vector<8x128xf32>
    %27 = arith.divf %25, %26 : vector<8x128xf32>
    %28 = math.tanh %22 : vector<8x128xf32>
    %29 = vector.extract_strided_slice %27 {offsets = [0, 0], sizes = [8, 32], strides = [1, 1]} : vector<8x128xf32> to vector<8x32xf32>
    %30 = vector.extract_strided_slice %27 {offsets = [0, 32], sizes = [8, 32], strides = [1, 1]} : vector<8x128xf32> to vector<8x32xf32>
    %31 = vector.extract_strided_slice %28 {offsets = [0, 64], sizes = [8, 32], strides = [1, 1]} : vector<8x128xf32> to vector<8x32xf32>
    %32 = vector.extract_strided_slice %27 {offsets = [0, 96], sizes = [8, 32], strides = [1, 1]} : vector<8x128xf32> to vector<8x32xf32>
    %33 = arith.mulf %30, %18 : vector<8x32xf32>
    %34 = arith.mulf %29, %31 : vector<8x32xf32>
    %35 = arith.addf %33, %34 : vector<8x32xf32>
    %36 = math.tanh %35 : vector<8x32xf32>
    %37 = arith.mulf %32, %36 : vector<8x32xf32>
    %38 = vector.extract_strided_slice %7 {offsets = [8, 0], sizes = [8, 128], strides = [1, 1]} : vector<64x128xf32> to vector<8x128xf32>
    %39 = arith.truncf %37 : vector<8x32xf32> to vector<8x32xbf16>
    %cst_20 = arith.constant dense<0.000000e+00> : vector<8x128xf32>
    %40 = tpu.matmul %39, %16, %cst_20 {dimension_numbers = #tpu.dot_dimension_numbers<[1], [0], [0], [1], [0, 0, 1, 1], [], []>} : vector<8x32xbf16>, vector<32x128xbf16>, vector<8x128xf32> -> vector<8x128xf32>
    %41 = arith.addf %38, %40 : vector<8x128xf32>
    %42 = arith.negf %41 : vector<8x128xf32>
    %43 = math.exp %42 : vector<8x128xf32>
    %cst_21 = arith.constant 1.000000e+00 : f32
    %44 = vector.broadcast %cst_21 : f32 to vector<8x128xf32>
    %45 = arith.addf %44, %43 : vector<8x128xf32>
    %46 = arith.divf %44, %45 : vector<8x128xf32>
    %47 = math.tanh %41 : vector<8x128xf32>
    %48 = vector.extract_strided_slice %46 {offsets = [0, 0], sizes = [8, 32], strides = [1, 1]} : vector<8x128xf32> to vector<8x32xf32>
    %49 = vector.extract_strided_slice %46 {offsets = [0, 32], sizes = [8, 32], strides = [1, 1]} : vector<8x128xf32> to vector<8x32xf32>
    %50 = vector.extract_strided_slice %47 {offsets = [0, 64], sizes = [8, 32], strides = [1, 1]} : vector<8x128xf32> to vector<8x32xf32>
    %51 = vector.extract_strided_slice %46 {offsets = [0, 96], sizes = [8, 32], strides = [1, 1]} : vector<8x128xf32> to vector<8x32xf32>
    %52 = arith.mulf %49, %35 : vector<8x32xf32>
    %53 = arith.mulf %48, %50 : vector<8x32xf32>
    %54 = arith.addf %52, %53 : vector<8x32xf32>
    %55 = math.tanh %54 : vector<8x32xf32>
    %56 = arith.mulf %51, %55 : vector<8x32xf32>
    %57 = vector.extract_strided_slice %7 {offsets = [16, 0], sizes = [8, 128], strides = [1, 1]} : vector<64x128xf32> to vector<8x128xf32>
    %58 = arith.truncf %56 : vector<8x32xf32> to vector<8x32xbf16>
    %cst_22 = arith.constant dense<0.000000e+00> : vector<8x128xf32>
    %59 = tpu.matmul %58, %16, %cst_22 {dimension_numbers = #tpu.dot_dimension_numbers<[1], [0], [0], [1], [0, 0, 1, 1], [], []>} : vector<8x32xbf16>, vector<32x128xbf16>, vector<8x128xf32> -> vector<8x128xf32>
    %60 = arith.addf %57, %59 : vector<8x128xf32>
    %61 = arith.negf %60 : vector<8x128xf32>
    %62 = math.exp %61 : vector<8x128xf32>
    %cst_23 = arith.constant 1.000000e+00 : f32
    %63 = vector.broadcast %cst_23 : f32 to vector<8x128xf32>
    %64 = arith.addf %63, %62 : vector<8x128xf32>
    %65 = arith.divf %63, %64 : vector<8x128xf32>
    %66 = math.tanh %60 : vector<8x128xf32>
    %67 = vector.extract_strided_slice %65 {offsets = [0, 0], sizes = [8, 32], strides = [1, 1]} : vector<8x128xf32> to vector<8x32xf32>
    %68 = vector.extract_strided_slice %65 {offsets = [0, 32], sizes = [8, 32], strides = [1, 1]} : vector<8x128xf32> to vector<8x32xf32>
    %69 = vector.extract_strided_slice %66 {offsets = [0, 64], sizes = [8, 32], strides = [1, 1]} : vector<8x128xf32> to vector<8x32xf32>
    %70 = vector.extract_strided_slice %65 {offsets = [0, 96], sizes = [8, 32], strides = [1, 1]} : vector<8x128xf32> to vector<8x32xf32>
    %71 = arith.mulf %68, %54 : vector<8x32xf32>
    %72 = arith.mulf %67, %69 : vector<8x32xf32>
    %73 = arith.addf %71, %72 : vector<8x32xf32>
    %74 = math.tanh %73 : vector<8x32xf32>
    %75 = arith.mulf %70, %74 : vector<8x32xf32>
    %76 = vector.extract_strided_slice %7 {offsets = [24, 0], sizes = [8, 128], strides = [1, 1]} : vector<64x128xf32> to vector<8x128xf32>
    %77 = arith.truncf %75 : vector<8x32xf32> to vector<8x32xbf16>
    %cst_24 = arith.constant dense<0.000000e+00> : vector<8x128xf32>
    %78 = tpu.matmul %77, %16, %cst_24 {dimension_numbers = #tpu.dot_dimension_numbers<[1], [0], [0], [1], [0, 0, 1, 1], [], []>} : vector<8x32xbf16>, vector<32x128xbf16>, vector<8x128xf32> -> vector<8x128xf32>
    %79 = arith.addf %76, %78 : vector<8x128xf32>
    %80 = arith.negf %79 : vector<8x128xf32>
    %81 = math.exp %80 : vector<8x128xf32>
    %cst_25 = arith.constant 1.000000e+00 : f32
    %82 = vector.broadcast %cst_25 : f32 to vector<8x128xf32>
    %83 = arith.addf %82, %81 : vector<8x128xf32>
    %84 = arith.divf %82, %83 : vector<8x128xf32>
    %85 = math.tanh %79 : vector<8x128xf32>
    %86 = vector.extract_strided_slice %84 {offsets = [0, 0], sizes = [8, 32], strides = [1, 1]} : vector<8x128xf32> to vector<8x32xf32>
    %87 = vector.extract_strided_slice %84 {offsets = [0, 32], sizes = [8, 32], strides = [1, 1]} : vector<8x128xf32> to vector<8x32xf32>
    %88 = vector.extract_strided_slice %85 {offsets = [0, 64], sizes = [8, 32], strides = [1, 1]} : vector<8x128xf32> to vector<8x32xf32>
    %89 = vector.extract_strided_slice %84 {offsets = [0, 96], sizes = [8, 32], strides = [1, 1]} : vector<8x128xf32> to vector<8x32xf32>
    %90 = arith.mulf %87, %73 : vector<8x32xf32>
    %91 = arith.mulf %86, %88 : vector<8x32xf32>
    %92 = arith.addf %90, %91 : vector<8x32xf32>
    %93 = math.tanh %92 : vector<8x32xf32>
    %94 = arith.mulf %89, %93 : vector<8x32xf32>
    %95 = vector.extract_strided_slice %7 {offsets = [32, 0], sizes = [8, 128], strides = [1, 1]} : vector<64x128xf32> to vector<8x128xf32>
    %96 = arith.truncf %94 : vector<8x32xf32> to vector<8x32xbf16>
    %cst_26 = arith.constant dense<0.000000e+00> : vector<8x128xf32>
    %97 = tpu.matmul %96, %16, %cst_26 {dimension_numbers = #tpu.dot_dimension_numbers<[1], [0], [0], [1], [0, 0, 1, 1], [], []>} : vector<8x32xbf16>, vector<32x128xbf16>, vector<8x128xf32> -> vector<8x128xf32>
    %98 = arith.addf %95, %97 : vector<8x128xf32>
    %99 = arith.negf %98 : vector<8x128xf32>
    %100 = math.exp %99 : vector<8x128xf32>
    %cst_27 = arith.constant 1.000000e+00 : f32
    %101 = vector.broadcast %cst_27 : f32 to vector<8x128xf32>
    %102 = arith.addf %101, %100 : vector<8x128xf32>
    %103 = arith.divf %101, %102 : vector<8x128xf32>
    %104 = math.tanh %98 : vector<8x128xf32>
    %105 = vector.extract_strided_slice %103 {offsets = [0, 0], sizes = [8, 32], strides = [1, 1]} : vector<8x128xf32> to vector<8x32xf32>
    %106 = vector.extract_strided_slice %103 {offsets = [0, 32], sizes = [8, 32], strides = [1, 1]} : vector<8x128xf32> to vector<8x32xf32>
    %107 = vector.extract_strided_slice %104 {offsets = [0, 64], sizes = [8, 32], strides = [1, 1]} : vector<8x128xf32> to vector<8x32xf32>
    %108 = vector.extract_strided_slice %103 {offsets = [0, 96], sizes = [8, 32], strides = [1, 1]} : vector<8x128xf32> to vector<8x32xf32>
    %109 = arith.mulf %106, %92 : vector<8x32xf32>
    %110 = arith.mulf %105, %107 : vector<8x32xf32>
    %111 = arith.addf %109, %110 : vector<8x32xf32>
    %112 = math.tanh %111 : vector<8x32xf32>
    %113 = arith.mulf %108, %112 : vector<8x32xf32>
    %114 = vector.extract_strided_slice %7 {offsets = [40, 0], sizes = [8, 128], strides = [1, 1]} : vector<64x128xf32> to vector<8x128xf32>
    %115 = arith.truncf %113 : vector<8x32xf32> to vector<8x32xbf16>
    %cst_28 = arith.constant dense<0.000000e+00> : vector<8x128xf32>
    %116 = tpu.matmul %115, %16, %cst_28 {dimension_numbers = #tpu.dot_dimension_numbers<[1], [0], [0], [1], [0, 0, 1, 1], [], []>} : vector<8x32xbf16>, vector<32x128xbf16>, vector<8x128xf32> -> vector<8x128xf32>
    %117 = arith.addf %114, %116 : vector<8x128xf32>
    %118 = arith.negf %117 : vector<8x128xf32>
    %119 = math.exp %118 : vector<8x128xf32>
    %cst_29 = arith.constant 1.000000e+00 : f32
    %120 = vector.broadcast %cst_29 : f32 to vector<8x128xf32>
    %121 = arith.addf %120, %119 : vector<8x128xf32>
    %122 = arith.divf %120, %121 : vector<8x128xf32>
    %123 = math.tanh %117 : vector<8x128xf32>
    %124 = vector.extract_strided_slice %122 {offsets = [0, 0], sizes = [8, 32], strides = [1, 1]} : vector<8x128xf32> to vector<8x32xf32>
    %125 = vector.extract_strided_slice %122 {offsets = [0, 32], sizes = [8, 32], strides = [1, 1]} : vector<8x128xf32> to vector<8x32xf32>
    %126 = vector.extract_strided_slice %123 {offsets = [0, 64], sizes = [8, 32], strides = [1, 1]} : vector<8x128xf32> to vector<8x32xf32>
    %127 = vector.extract_strided_slice %122 {offsets = [0, 96], sizes = [8, 32], strides = [1, 1]} : vector<8x128xf32> to vector<8x32xf32>
    %128 = arith.mulf %125, %111 : vector<8x32xf32>
    %129 = arith.mulf %124, %126 : vector<8x32xf32>
    %130 = arith.addf %128, %129 : vector<8x32xf32>
    %131 = math.tanh %130 : vector<8x32xf32>
    %132 = arith.mulf %127, %131 : vector<8x32xf32>
    %133 = vector.extract_strided_slice %7 {offsets = [48, 0], sizes = [8, 128], strides = [1, 1]} : vector<64x128xf32> to vector<8x128xf32>
    %134 = arith.truncf %132 : vector<8x32xf32> to vector<8x32xbf16>
    %cst_30 = arith.constant dense<0.000000e+00> : vector<8x128xf32>
    %135 = tpu.matmul %134, %16, %cst_30 {dimension_numbers = #tpu.dot_dimension_numbers<[1], [0], [0], [1], [0, 0, 1, 1], [], []>} : vector<8x32xbf16>, vector<32x128xbf16>, vector<8x128xf32> -> vector<8x128xf32>
    %136 = arith.addf %133, %135 : vector<8x128xf32>
    %137 = arith.negf %136 : vector<8x128xf32>
    %138 = math.exp %137 : vector<8x128xf32>
    %cst_31 = arith.constant 1.000000e+00 : f32
    %139 = vector.broadcast %cst_31 : f32 to vector<8x128xf32>
    %140 = arith.addf %139, %138 : vector<8x128xf32>
    %141 = arith.divf %139, %140 : vector<8x128xf32>
    %142 = math.tanh %136 : vector<8x128xf32>
    %143 = vector.extract_strided_slice %141 {offsets = [0, 0], sizes = [8, 32], strides = [1, 1]} : vector<8x128xf32> to vector<8x32xf32>
    %144 = vector.extract_strided_slice %141 {offsets = [0, 32], sizes = [8, 32], strides = [1, 1]} : vector<8x128xf32> to vector<8x32xf32>
    %145 = vector.extract_strided_slice %142 {offsets = [0, 64], sizes = [8, 32], strides = [1, 1]} : vector<8x128xf32> to vector<8x32xf32>
    %146 = vector.extract_strided_slice %141 {offsets = [0, 96], sizes = [8, 32], strides = [1, 1]} : vector<8x128xf32> to vector<8x32xf32>
    %147 = arith.mulf %144, %130 : vector<8x32xf32>
    %148 = arith.mulf %143, %145 : vector<8x32xf32>
    %149 = arith.addf %147, %148 : vector<8x32xf32>
    %150 = math.tanh %149 : vector<8x32xf32>
    %151 = arith.mulf %146, %150 : vector<8x32xf32>
    %152 = vector.extract_strided_slice %7 {offsets = [56, 0], sizes = [8, 128], strides = [1, 1]} : vector<64x128xf32> to vector<8x128xf32>
    %153 = arith.truncf %151 : vector<8x32xf32> to vector<8x32xbf16>
    %cst_32 = arith.constant dense<0.000000e+00> : vector<8x128xf32>
    %154 = tpu.matmul %153, %16, %cst_32 {dimension_numbers = #tpu.dot_dimension_numbers<[1], [0], [0], [1], [0, 0, 1, 1], [], []>} : vector<8x32xbf16>, vector<32x128xbf16>, vector<8x128xf32> -> vector<8x128xf32>
    %155 = arith.addf %152, %154 : vector<8x128xf32>
    %156 = arith.negf %155 : vector<8x128xf32>
    %157 = math.exp %156 : vector<8x128xf32>
    %cst_33 = arith.constant 1.000000e+00 : f32
    %158 = vector.broadcast %cst_33 : f32 to vector<8x128xf32>
    %159 = arith.addf %158, %157 : vector<8x128xf32>
    %160 = arith.divf %158, %159 : vector<8x128xf32>
    %161 = math.tanh %155 : vector<8x128xf32>
    %162 = vector.extract_strided_slice %160 {offsets = [0, 0], sizes = [8, 32], strides = [1, 1]} : vector<8x128xf32> to vector<8x32xf32>
    %163 = vector.extract_strided_slice %160 {offsets = [0, 32], sizes = [8, 32], strides = [1, 1]} : vector<8x128xf32> to vector<8x32xf32>
    %164 = vector.extract_strided_slice %161 {offsets = [0, 64], sizes = [8, 32], strides = [1, 1]} : vector<8x128xf32> to vector<8x32xf32>
    %165 = vector.extract_strided_slice %160 {offsets = [0, 96], sizes = [8, 32], strides = [1, 1]} : vector<8x128xf32> to vector<8x32xf32>
    %166 = arith.mulf %163, %149 : vector<8x32xf32>
    %167 = arith.mulf %162, %164 : vector<8x32xf32>
    %168 = arith.addf %166, %167 : vector<8x32xf32>
    %169 = math.tanh %168 : vector<8x32xf32>
    %170 = arith.mulf %165, %169 : vector<8x32xf32>
    %c1_34 = arith.constant 1 : index
    %c0_35 = arith.constant 0 : index
    %c0_36 = arith.constant 0 : index
    %171 = vector.load %arg2[%c1_34, %c0_35, %c0_36] : memref<2x32x128xbf16, #tpu.memory_space<vmem>>, vector<1x32x128xbf16>
    %172 = vector.shape_cast %171 : vector<1x32x128xbf16> to vector<32x128xbf16>
    %cst_37 = arith.constant 0.000000e+00 : f32
    %173 = vector.broadcast %cst_37 : f32 to vector<8x32xf32>
    %cst_38 = arith.constant 0.000000e+00 : f32
    %174 = vector.broadcast %cst_38 : f32 to vector<8x32xf32>
    %175 = vector.extract_strided_slice %14 {offsets = [56, 0], sizes = [8, 128], strides = [1, 1]} : vector<64x128xf32> to vector<8x128xf32>
    %176 = arith.truncf %173 : vector<8x32xf32> to vector<8x32xbf16>
    %cst_39 = arith.constant dense<0.000000e+00> : vector<8x128xf32>
    %177 = tpu.matmul %176, %172, %cst_39 {dimension_numbers = #tpu.dot_dimension_numbers<[1], [0], [0], [1], [0, 0, 1, 1], [], []>} : vector<8x32xbf16>, vector<32x128xbf16>, vector<8x128xf32> -> vector<8x128xf32>
    %178 = arith.addf %175, %177 : vector<8x128xf32>
    %179 = arith.negf %178 : vector<8x128xf32>
    %180 = math.exp %179 : vector<8x128xf32>
    %cst_40 = arith.constant 1.000000e+00 : f32
    %181 = vector.broadcast %cst_40 : f32 to vector<8x128xf32>
    %182 = arith.addf %181, %180 : vector<8x128xf32>
    %183 = arith.divf %181, %182 : vector<8x128xf32>
    %184 = math.tanh %178 : vector<8x128xf32>
    %185 = vector.extract_strided_slice %183 {offsets = [0, 0], sizes = [8, 32], strides = [1, 1]} : vector<8x128xf32> to vector<8x32xf32>
    %186 = vector.extract_strided_slice %183 {offsets = [0, 32], sizes = [8, 32], strides = [1, 1]} : vector<8x128xf32> to vector<8x32xf32>
    %187 = vector.extract_strided_slice %184 {offsets = [0, 64], sizes = [8, 32], strides = [1, 1]} : vector<8x128xf32> to vector<8x32xf32>
    %188 = vector.extract_strided_slice %183 {offsets = [0, 96], sizes = [8, 32], strides = [1, 1]} : vector<8x128xf32> to vector<8x32xf32>
    %189 = arith.mulf %186, %174 : vector<8x32xf32>
    %190 = arith.mulf %185, %187 : vector<8x32xf32>
    %191 = arith.addf %189, %190 : vector<8x32xf32>
    %192 = math.tanh %191 : vector<8x32xf32>
    %193 = arith.mulf %188, %192 : vector<8x32xf32>
    %194 = vector.extract_strided_slice %14 {offsets = [48, 0], sizes = [8, 128], strides = [1, 1]} : vector<64x128xf32> to vector<8x128xf32>
    %195 = arith.truncf %193 : vector<8x32xf32> to vector<8x32xbf16>
    %cst_41 = arith.constant dense<0.000000e+00> : vector<8x128xf32>
    %196 = tpu.matmul %195, %172, %cst_41 {dimension_numbers = #tpu.dot_dimension_numbers<[1], [0], [0], [1], [0, 0, 1, 1], [], []>} : vector<8x32xbf16>, vector<32x128xbf16>, vector<8x128xf32> -> vector<8x128xf32>
    %197 = arith.addf %194, %196 : vector<8x128xf32>
    %198 = arith.negf %197 : vector<8x128xf32>
    %199 = math.exp %198 : vector<8x128xf32>
    %cst_42 = arith.constant 1.000000e+00 : f32
    %200 = vector.broadcast %cst_42 : f32 to vector<8x128xf32>
    %201 = arith.addf %200, %199 : vector<8x128xf32>
    %202 = arith.divf %200, %201 : vector<8x128xf32>
    %203 = math.tanh %197 : vector<8x128xf32>
    %204 = vector.extract_strided_slice %202 {offsets = [0, 0], sizes = [8, 32], strides = [1, 1]} : vector<8x128xf32> to vector<8x32xf32>
    %205 = vector.extract_strided_slice %202 {offsets = [0, 32], sizes = [8, 32], strides = [1, 1]} : vector<8x128xf32> to vector<8x32xf32>
    %206 = vector.extract_strided_slice %203 {offsets = [0, 64], sizes = [8, 32], strides = [1, 1]} : vector<8x128xf32> to vector<8x32xf32>
    %207 = vector.extract_strided_slice %202 {offsets = [0, 96], sizes = [8, 32], strides = [1, 1]} : vector<8x128xf32> to vector<8x32xf32>
    %208 = arith.mulf %205, %191 : vector<8x32xf32>
    %209 = arith.mulf %204, %206 : vector<8x32xf32>
    %210 = arith.addf %208, %209 : vector<8x32xf32>
    %211 = math.tanh %210 : vector<8x32xf32>
    %212 = arith.mulf %207, %211 : vector<8x32xf32>
    %213 = vector.extract_strided_slice %14 {offsets = [40, 0], sizes = [8, 128], strides = [1, 1]} : vector<64x128xf32> to vector<8x128xf32>
    %214 = arith.truncf %212 : vector<8x32xf32> to vector<8x32xbf16>
    %cst_43 = arith.constant dense<0.000000e+00> : vector<8x128xf32>
    %215 = tpu.matmul %214, %172, %cst_43 {dimension_numbers = #tpu.dot_dimension_numbers<[1], [0], [0], [1], [0, 0, 1, 1], [], []>} : vector<8x32xbf16>, vector<32x128xbf16>, vector<8x128xf32> -> vector<8x128xf32>
    %216 = arith.addf %213, %215 : vector<8x128xf32>
    %217 = arith.negf %216 : vector<8x128xf32>
    %218 = math.exp %217 : vector<8x128xf32>
    %cst_44 = arith.constant 1.000000e+00 : f32
    %219 = vector.broadcast %cst_44 : f32 to vector<8x128xf32>
    %220 = arith.addf %219, %218 : vector<8x128xf32>
    %221 = arith.divf %219, %220 : vector<8x128xf32>
    %222 = math.tanh %216 : vector<8x128xf32>
    %223 = vector.extract_strided_slice %221 {offsets = [0, 0], sizes = [8, 32], strides = [1, 1]} : vector<8x128xf32> to vector<8x32xf32>
    %224 = vector.extract_strided_slice %221 {offsets = [0, 32], sizes = [8, 32], strides = [1, 1]} : vector<8x128xf32> to vector<8x32xf32>
    %225 = vector.extract_strided_slice %222 {offsets = [0, 64], sizes = [8, 32], strides = [1, 1]} : vector<8x128xf32> to vector<8x32xf32>
    %226 = vector.extract_strided_slice %221 {offsets = [0, 96], sizes = [8, 32], strides = [1, 1]} : vector<8x128xf32> to vector<8x32xf32>
    %227 = arith.mulf %224, %210 : vector<8x32xf32>
    %228 = arith.mulf %223, %225 : vector<8x32xf32>
    %229 = arith.addf %227, %228 : vector<8x32xf32>
    %230 = math.tanh %229 : vector<8x32xf32>
    %231 = arith.mulf %226, %230 : vector<8x32xf32>
    %232 = vector.extract_strided_slice %14 {offsets = [32, 0], sizes = [8, 128], strides = [1, 1]} : vector<64x128xf32> to vector<8x128xf32>
    %233 = arith.truncf %231 : vector<8x32xf32> to vector<8x32xbf16>
    %cst_45 = arith.constant dense<0.000000e+00> : vector<8x128xf32>
    %234 = tpu.matmul %233, %172, %cst_45 {dimension_numbers = #tpu.dot_dimension_numbers<[1], [0], [0], [1], [0, 0, 1, 1], [], []>} : vector<8x32xbf16>, vector<32x128xbf16>, vector<8x128xf32> -> vector<8x128xf32>
    %235 = arith.addf %232, %234 : vector<8x128xf32>
    %236 = arith.negf %235 : vector<8x128xf32>
    %237 = math.exp %236 : vector<8x128xf32>
    %cst_46 = arith.constant 1.000000e+00 : f32
    %238 = vector.broadcast %cst_46 : f32 to vector<8x128xf32>
    %239 = arith.addf %238, %237 : vector<8x128xf32>
    %240 = arith.divf %238, %239 : vector<8x128xf32>
    %241 = math.tanh %235 : vector<8x128xf32>
    %242 = vector.extract_strided_slice %240 {offsets = [0, 0], sizes = [8, 32], strides = [1, 1]} : vector<8x128xf32> to vector<8x32xf32>
    %243 = vector.extract_strided_slice %240 {offsets = [0, 32], sizes = [8, 32], strides = [1, 1]} : vector<8x128xf32> to vector<8x32xf32>
    %244 = vector.extract_strided_slice %241 {offsets = [0, 64], sizes = [8, 32], strides = [1, 1]} : vector<8x128xf32> to vector<8x32xf32>
    %245 = vector.extract_strided_slice %240 {offsets = [0, 96], sizes = [8, 32], strides = [1, 1]} : vector<8x128xf32> to vector<8x32xf32>
    %246 = arith.mulf %243, %229 : vector<8x32xf32>
    %247 = arith.mulf %242, %244 : vector<8x32xf32>
    %248 = arith.addf %246, %247 : vector<8x32xf32>
    %249 = math.tanh %248 : vector<8x32xf32>
    %250 = arith.mulf %245, %249 : vector<8x32xf32>
    %251 = vector.extract_strided_slice %14 {offsets = [24, 0], sizes = [8, 128], strides = [1, 1]} : vector<64x128xf32> to vector<8x128xf32>
    %252 = arith.truncf %250 : vector<8x32xf32> to vector<8x32xbf16>
    %cst_47 = arith.constant dense<0.000000e+00> : vector<8x128xf32>
    %253 = tpu.matmul %252, %172, %cst_47 {dimension_numbers = #tpu.dot_dimension_numbers<[1], [0], [0], [1], [0, 0, 1, 1], [], []>} : vector<8x32xbf16>, vector<32x128xbf16>, vector<8x128xf32> -> vector<8x128xf32>
    %254 = arith.addf %251, %253 : vector<8x128xf32>
    %255 = arith.negf %254 : vector<8x128xf32>
    %256 = math.exp %255 : vector<8x128xf32>
    %cst_48 = arith.constant 1.000000e+00 : f32
    %257 = vector.broadcast %cst_48 : f32 to vector<8x128xf32>
    %258 = arith.addf %257, %256 : vector<8x128xf32>
    %259 = arith.divf %257, %258 : vector<8x128xf32>
    %260 = math.tanh %254 : vector<8x128xf32>
    %261 = vector.extract_strided_slice %259 {offsets = [0, 0], sizes = [8, 32], strides = [1, 1]} : vector<8x128xf32> to vector<8x32xf32>
    %262 = vector.extract_strided_slice %259 {offsets = [0, 32], sizes = [8, 32], strides = [1, 1]} : vector<8x128xf32> to vector<8x32xf32>
    %263 = vector.extract_strided_slice %260 {offsets = [0, 64], sizes = [8, 32], strides = [1, 1]} : vector<8x128xf32> to vector<8x32xf32>
    %264 = vector.extract_strided_slice %259 {offsets = [0, 96], sizes = [8, 32], strides = [1, 1]} : vector<8x128xf32> to vector<8x32xf32>
    %265 = arith.mulf %262, %248 : vector<8x32xf32>
    %266 = arith.mulf %261, %263 : vector<8x32xf32>
    %267 = arith.addf %265, %266 : vector<8x32xf32>
    %268 = math.tanh %267 : vector<8x32xf32>
    %269 = arith.mulf %264, %268 : vector<8x32xf32>
    %270 = vector.extract_strided_slice %14 {offsets = [16, 0], sizes = [8, 128], strides = [1, 1]} : vector<64x128xf32> to vector<8x128xf32>
    %271 = arith.truncf %269 : vector<8x32xf32> to vector<8x32xbf16>
    %cst_49 = arith.constant dense<0.000000e+00> : vector<8x128xf32>
    %272 = tpu.matmul %271, %172, %cst_49 {dimension_numbers = #tpu.dot_dimension_numbers<[1], [0], [0], [1], [0, 0, 1, 1], [], []>} : vector<8x32xbf16>, vector<32x128xbf16>, vector<8x128xf32> -> vector<8x128xf32>
    %273 = arith.addf %270, %272 : vector<8x128xf32>
    %274 = arith.negf %273 : vector<8x128xf32>
    %275 = math.exp %274 : vector<8x128xf32>
    %cst_50 = arith.constant 1.000000e+00 : f32
    %276 = vector.broadcast %cst_50 : f32 to vector<8x128xf32>
    %277 = arith.addf %276, %275 : vector<8x128xf32>
    %278 = arith.divf %276, %277 : vector<8x128xf32>
    %279 = math.tanh %273 : vector<8x128xf32>
    %280 = vector.extract_strided_slice %278 {offsets = [0, 0], sizes = [8, 32], strides = [1, 1]} : vector<8x128xf32> to vector<8x32xf32>
    %281 = vector.extract_strided_slice %278 {offsets = [0, 32], sizes = [8, 32], strides = [1, 1]} : vector<8x128xf32> to vector<8x32xf32>
    %282 = vector.extract_strided_slice %279 {offsets = [0, 64], sizes = [8, 32], strides = [1, 1]} : vector<8x128xf32> to vector<8x32xf32>
    %283 = vector.extract_strided_slice %278 {offsets = [0, 96], sizes = [8, 32], strides = [1, 1]} : vector<8x128xf32> to vector<8x32xf32>
    %284 = arith.mulf %281, %267 : vector<8x32xf32>
    %285 = arith.mulf %280, %282 : vector<8x32xf32>
    %286 = arith.addf %284, %285 : vector<8x32xf32>
    %287 = math.tanh %286 : vector<8x32xf32>
    %288 = arith.mulf %283, %287 : vector<8x32xf32>
    %289 = vector.extract_strided_slice %14 {offsets = [8, 0], sizes = [8, 128], strides = [1, 1]} : vector<64x128xf32> to vector<8x128xf32>
    %290 = arith.truncf %288 : vector<8x32xf32> to vector<8x32xbf16>
    %cst_51 = arith.constant dense<0.000000e+00> : vector<8x128xf32>
    %291 = tpu.matmul %290, %172, %cst_51 {dimension_numbers = #tpu.dot_dimension_numbers<[1], [0], [0], [1], [0, 0, 1, 1], [], []>} : vector<8x32xbf16>, vector<32x128xbf16>, vector<8x128xf32> -> vector<8x128xf32>
    %292 = arith.addf %289, %291 : vector<8x128xf32>
    %293 = arith.negf %292 : vector<8x128xf32>
    %294 = math.exp %293 : vector<8x128xf32>
    %cst_52 = arith.constant 1.000000e+00 : f32
    %295 = vector.broadcast %cst_52 : f32 to vector<8x128xf32>
    %296 = arith.addf %295, %294 : vector<8x128xf32>
    %297 = arith.divf %295, %296 : vector<8x128xf32>
    %298 = math.tanh %292 : vector<8x128xf32>
    %299 = vector.extract_strided_slice %297 {offsets = [0, 0], sizes = [8, 32], strides = [1, 1]} : vector<8x128xf32> to vector<8x32xf32>
    %300 = vector.extract_strided_slice %297 {offsets = [0, 32], sizes = [8, 32], strides = [1, 1]} : vector<8x128xf32> to vector<8x32xf32>
    %301 = vector.extract_strided_slice %298 {offsets = [0, 64], sizes = [8, 32], strides = [1, 1]} : vector<8x128xf32> to vector<8x32xf32>
    %302 = vector.extract_strided_slice %297 {offsets = [0, 96], sizes = [8, 32], strides = [1, 1]} : vector<8x128xf32> to vector<8x32xf32>
    %303 = arith.mulf %300, %286 : vector<8x32xf32>
    %304 = arith.mulf %299, %301 : vector<8x32xf32>
    %305 = arith.addf %303, %304 : vector<8x32xf32>
    %306 = math.tanh %305 : vector<8x32xf32>
    %307 = arith.mulf %302, %306 : vector<8x32xf32>
    %308 = vector.extract_strided_slice %14 {offsets = [0, 0], sizes = [8, 128], strides = [1, 1]} : vector<64x128xf32> to vector<8x128xf32>
    %309 = arith.truncf %307 : vector<8x32xf32> to vector<8x32xbf16>
    %cst_53 = arith.constant dense<0.000000e+00> : vector<8x128xf32>
    %310 = tpu.matmul %309, %172, %cst_53 {dimension_numbers = #tpu.dot_dimension_numbers<[1], [0], [0], [1], [0, 0, 1, 1], [], []>} : vector<8x32xbf16>, vector<32x128xbf16>, vector<8x128xf32> -> vector<8x128xf32>
    %311 = arith.addf %308, %310 : vector<8x128xf32>
    %312 = arith.negf %311 : vector<8x128xf32>
    %313 = math.exp %312 : vector<8x128xf32>
    %cst_54 = arith.constant 1.000000e+00 : f32
    %314 = vector.broadcast %cst_54 : f32 to vector<8x128xf32>
    %315 = arith.addf %314, %313 : vector<8x128xf32>
    %316 = arith.divf %314, %315 : vector<8x128xf32>
    %317 = math.tanh %311 : vector<8x128xf32>
    %318 = vector.extract_strided_slice %316 {offsets = [0, 0], sizes = [8, 32], strides = [1, 1]} : vector<8x128xf32> to vector<8x32xf32>
    %319 = vector.extract_strided_slice %316 {offsets = [0, 32], sizes = [8, 32], strides = [1, 1]} : vector<8x128xf32> to vector<8x32xf32>
    %320 = vector.extract_strided_slice %317 {offsets = [0, 64], sizes = [8, 32], strides = [1, 1]} : vector<8x128xf32> to vector<8x32xf32>
    %321 = vector.extract_strided_slice %316 {offsets = [0, 96], sizes = [8, 32], strides = [1, 1]} : vector<8x128xf32> to vector<8x32xf32>
    %322 = arith.mulf %319, %305 : vector<8x32xf32>
    %323 = arith.mulf %318, %320 : vector<8x32xf32>
    %324 = arith.addf %322, %323 : vector<8x32xf32>
    %325 = math.tanh %324 : vector<8x32xf32>
    %326 = arith.mulf %321, %325 : vector<8x32xf32>
    %327 = tpu.concatenate %37, %56, %75, %94, %113, %132, %151, %170 in 0 : vector<8x32xf32>, vector<8x32xf32>, vector<8x32xf32>, vector<8x32xf32>, vector<8x32xf32>, vector<8x32xf32>, vector<8x32xf32>, vector<8x32xf32> -> vector<64x32xf32>
    %328 = tpu.concatenate %326, %307, %288, %269, %250, %231, %212, %193 in 0 : vector<8x32xf32>, vector<8x32xf32>, vector<8x32xf32>, vector<8x32xf32>, vector<8x32xf32>, vector<8x32xf32>, vector<8x32xf32>, vector<8x32xf32> -> vector<64x32xf32>
    %329 = tpu.concatenate %327, %328 in 1 : vector<64x32xf32>, vector<64x32xf32> -> vector<64x64xf32>
    %c0_55 = arith.constant 0 : index
    %c0_56 = arith.constant 0 : index
    %c0_57 = arith.constant 0 : index
    %330 = vector.load %arg4[%c0_55, %c0_56, %c0_57] : memref<2x64x128xf32, #tpu.memory_space<vmem>>, vector<1x64x128xf32>
    %331 = vector.shape_cast %330 : vector<1x64x128xf32> to vector<64x128xf32>
    %cst_58 = arith.constant dense<0.000000e+00> : vector<64x128xf32>
    %332 = tpu.matmul %329, %331, %cst_58 {dimension_numbers = #tpu.dot_dimension_numbers<[1], [0], [0], [1], [0, 0, 1, 1], [], []>} : vector<64x64xf32>, vector<64x128xf32>, vector<64x128xf32> -> vector<64x128xf32>
    %c0_59 = arith.constant 0 : index
    %c0_60 = arith.constant 0 : index
    %c0_61 = arith.constant 0 : index
    %333 = vector.load %arg6[%c0_59, %c0_60, %c0_61] : memref<2x1x128xf32, #tpu.memory_space<vmem>>, vector<1x1x128xf32>
    %334 = vector.shape_cast %333 : vector<1x1x128xf32> to vector<1x128xf32>
    %335 = vector.broadcast %334 : vector<1x128xf32> to vector<64x128xf32>
    %336 = arith.addf %332, %335 : vector<64x128xf32>
    %c1_62 = arith.constant 1 : index
    %c0_63 = arith.constant 0 : index
    %c0_64 = arith.constant 0 : index
    %337 = vector.load %arg4[%c1_62, %c0_63, %c0_64] : memref<2x64x128xf32, #tpu.memory_space<vmem>>, vector<1x64x128xf32>
    %338 = vector.shape_cast %337 : vector<1x64x128xf32> to vector<64x128xf32>
    %cst_65 = arith.constant dense<0.000000e+00> : vector<64x128xf32>
    %339 = tpu.matmul %329, %338, %cst_65 {dimension_numbers = #tpu.dot_dimension_numbers<[1], [0], [0], [1], [0, 0, 1, 1], [], []>} : vector<64x64xf32>, vector<64x128xf32>, vector<64x128xf32> -> vector<64x128xf32>
    %c1_66 = arith.constant 1 : index
    %c0_67 = arith.constant 0 : index
    %c0_68 = arith.constant 0 : index
    %340 = vector.load %arg6[%c1_66, %c0_67, %c0_68] : memref<2x1x128xf32, #tpu.memory_space<vmem>>, vector<1x1x128xf32>
    %341 = vector.shape_cast %340 : vector<1x1x128xf32> to vector<1x128xf32>
    %342 = vector.broadcast %341 : vector<1x128xf32> to vector<64x128xf32>
    %343 = arith.addf %339, %342 : vector<64x128xf32>
    %c0_69 = arith.constant 0 : index
    %c0_70 = arith.constant 0 : index
    %c0_71 = arith.constant 0 : index
    %344 = vector.load %arg5[%c0_69, %c0_70, %c0_71] : memref<2x32x128xbf16, #tpu.memory_space<vmem>>, vector<1x32x128xbf16>
    %345 = vector.shape_cast %344 : vector<1x32x128xbf16> to vector<32x128xbf16>
    %cst_72 = arith.constant 0.000000e+00 : f32
    %346 = vector.broadcast %cst_72 : f32 to vector<8x32xf32>
    %cst_73 = arith.constant 0.000000e+00 : f32
    %347 = vector.broadcast %cst_73 : f32 to vector<8x32xf32>
    %348 = vector.extract_strided_slice %336 {offsets = [0, 0], sizes = [8, 128], strides = [1, 1]} : vector<64x128xf32> to vector<8x128xf32>
    %349 = arith.truncf %346 : vector<8x32xf32> to vector<8x32xbf16>
    %cst_74 = arith.constant dense<0.000000e+00> : vector<8x128xf32>
    %350 = tpu.matmul %349, %345, %cst_74 {dimension_numbers = #tpu.dot_dimension_numbers<[1], [0], [0], [1], [0, 0, 1, 1], [], []>} : vector<8x32xbf16>, vector<32x128xbf16>, vector<8x128xf32> -> vector<8x128xf32>
    %351 = arith.addf %348, %350 : vector<8x128xf32>
    %352 = arith.negf %351 : vector<8x128xf32>
    %353 = math.exp %352 : vector<8x128xf32>
    %cst_75 = arith.constant 1.000000e+00 : f32
    %354 = vector.broadcast %cst_75 : f32 to vector<8x128xf32>
    %355 = arith.addf %354, %353 : vector<8x128xf32>
    %356 = arith.divf %354, %355 : vector<8x128xf32>
    %357 = math.tanh %351 : vector<8x128xf32>
    %358 = vector.extract_strided_slice %356 {offsets = [0, 0], sizes = [8, 32], strides = [1, 1]} : vector<8x128xf32> to vector<8x32xf32>
    %359 = vector.extract_strided_slice %356 {offsets = [0, 32], sizes = [8, 32], strides = [1, 1]} : vector<8x128xf32> to vector<8x32xf32>
    %360 = vector.extract_strided_slice %357 {offsets = [0, 64], sizes = [8, 32], strides = [1, 1]} : vector<8x128xf32> to vector<8x32xf32>
    %361 = vector.extract_strided_slice %356 {offsets = [0, 96], sizes = [8, 32], strides = [1, 1]} : vector<8x128xf32> to vector<8x32xf32>
    %362 = arith.mulf %359, %347 : vector<8x32xf32>
    %363 = arith.mulf %358, %360 : vector<8x32xf32>
    %364 = arith.addf %362, %363 : vector<8x32xf32>
    %365 = math.tanh %364 : vector<8x32xf32>
    %366 = arith.mulf %361, %365 : vector<8x32xf32>
    %367 = vector.extract_strided_slice %336 {offsets = [8, 0], sizes = [8, 128], strides = [1, 1]} : vector<64x128xf32> to vector<8x128xf32>
    %368 = arith.truncf %366 : vector<8x32xf32> to vector<8x32xbf16>
    %cst_76 = arith.constant dense<0.000000e+00> : vector<8x128xf32>
    %369 = tpu.matmul %368, %345, %cst_76 {dimension_numbers = #tpu.dot_dimension_numbers<[1], [0], [0], [1], [0, 0, 1, 1], [], []>} : vector<8x32xbf16>, vector<32x128xbf16>, vector<8x128xf32> -> vector<8x128xf32>
    %370 = arith.addf %367, %369 : vector<8x128xf32>
    %371 = arith.negf %370 : vector<8x128xf32>
    %372 = math.exp %371 : vector<8x128xf32>
    %cst_77 = arith.constant 1.000000e+00 : f32
    %373 = vector.broadcast %cst_77 : f32 to vector<8x128xf32>
    %374 = arith.addf %373, %372 : vector<8x128xf32>
    %375 = arith.divf %373, %374 : vector<8x128xf32>
    %376 = math.tanh %370 : vector<8x128xf32>
    %377 = vector.extract_strided_slice %375 {offsets = [0, 0], sizes = [8, 32], strides = [1, 1]} : vector<8x128xf32> to vector<8x32xf32>
    %378 = vector.extract_strided_slice %375 {offsets = [0, 32], sizes = [8, 32], strides = [1, 1]} : vector<8x128xf32> to vector<8x32xf32>
    %379 = vector.extract_strided_slice %376 {offsets = [0, 64], sizes = [8, 32], strides = [1, 1]} : vector<8x128xf32> to vector<8x32xf32>
    %380 = vector.extract_strided_slice %375 {offsets = [0, 96], sizes = [8, 32], strides = [1, 1]} : vector<8x128xf32> to vector<8x32xf32>
    %381 = arith.mulf %378, %364 : vector<8x32xf32>
    %382 = arith.mulf %377, %379 : vector<8x32xf32>
    %383 = arith.addf %381, %382 : vector<8x32xf32>
    %384 = math.tanh %383 : vector<8x32xf32>
    %385 = arith.mulf %380, %384 : vector<8x32xf32>
    %386 = vector.extract_strided_slice %336 {offsets = [16, 0], sizes = [8, 128], strides = [1, 1]} : vector<64x128xf32> to vector<8x128xf32>
    %387 = arith.truncf %385 : vector<8x32xf32> to vector<8x32xbf16>
    %cst_78 = arith.constant dense<0.000000e+00> : vector<8x128xf32>
    %388 = tpu.matmul %387, %345, %cst_78 {dimension_numbers = #tpu.dot_dimension_numbers<[1], [0], [0], [1], [0, 0, 1, 1], [], []>} : vector<8x32xbf16>, vector<32x128xbf16>, vector<8x128xf32> -> vector<8x128xf32>
    %389 = arith.addf %386, %388 : vector<8x128xf32>
    %390 = arith.negf %389 : vector<8x128xf32>
    %391 = math.exp %390 : vector<8x128xf32>
    %cst_79 = arith.constant 1.000000e+00 : f32
    %392 = vector.broadcast %cst_79 : f32 to vector<8x128xf32>
    %393 = arith.addf %392, %391 : vector<8x128xf32>
    %394 = arith.divf %392, %393 : vector<8x128xf32>
    %395 = math.tanh %389 : vector<8x128xf32>
    %396 = vector.extract_strided_slice %394 {offsets = [0, 0], sizes = [8, 32], strides = [1, 1]} : vector<8x128xf32> to vector<8x32xf32>
    %397 = vector.extract_strided_slice %394 {offsets = [0, 32], sizes = [8, 32], strides = [1, 1]} : vector<8x128xf32> to vector<8x32xf32>
    %398 = vector.extract_strided_slice %395 {offsets = [0, 64], sizes = [8, 32], strides = [1, 1]} : vector<8x128xf32> to vector<8x32xf32>
    %399 = vector.extract_strided_slice %394 {offsets = [0, 96], sizes = [8, 32], strides = [1, 1]} : vector<8x128xf32> to vector<8x32xf32>
    %400 = arith.mulf %397, %383 : vector<8x32xf32>
    %401 = arith.mulf %396, %398 : vector<8x32xf32>
    %402 = arith.addf %400, %401 : vector<8x32xf32>
    %403 = math.tanh %402 : vector<8x32xf32>
    %404 = arith.mulf %399, %403 : vector<8x32xf32>
    %405 = vector.extract_strided_slice %336 {offsets = [24, 0], sizes = [8, 128], strides = [1, 1]} : vector<64x128xf32> to vector<8x128xf32>
    %406 = arith.truncf %404 : vector<8x32xf32> to vector<8x32xbf16>
    %cst_80 = arith.constant dense<0.000000e+00> : vector<8x128xf32>
    %407 = tpu.matmul %406, %345, %cst_80 {dimension_numbers = #tpu.dot_dimension_numbers<[1], [0], [0], [1], [0, 0, 1, 1], [], []>} : vector<8x32xbf16>, vector<32x128xbf16>, vector<8x128xf32> -> vector<8x128xf32>
    %408 = arith.addf %405, %407 : vector<8x128xf32>
    %409 = arith.negf %408 : vector<8x128xf32>
    %410 = math.exp %409 : vector<8x128xf32>
    %cst_81 = arith.constant 1.000000e+00 : f32
    %411 = vector.broadcast %cst_81 : f32 to vector<8x128xf32>
    %412 = arith.addf %411, %410 : vector<8x128xf32>
    %413 = arith.divf %411, %412 : vector<8x128xf32>
    %414 = math.tanh %408 : vector<8x128xf32>
    %415 = vector.extract_strided_slice %413 {offsets = [0, 0], sizes = [8, 32], strides = [1, 1]} : vector<8x128xf32> to vector<8x32xf32>
    %416 = vector.extract_strided_slice %413 {offsets = [0, 32], sizes = [8, 32], strides = [1, 1]} : vector<8x128xf32> to vector<8x32xf32>
    %417 = vector.extract_strided_slice %414 {offsets = [0, 64], sizes = [8, 32], strides = [1, 1]} : vector<8x128xf32> to vector<8x32xf32>
    %418 = vector.extract_strided_slice %413 {offsets = [0, 96], sizes = [8, 32], strides = [1, 1]} : vector<8x128xf32> to vector<8x32xf32>
    %419 = arith.mulf %416, %402 : vector<8x32xf32>
    %420 = arith.mulf %415, %417 : vector<8x32xf32>
    %421 = arith.addf %419, %420 : vector<8x32xf32>
    %422 = math.tanh %421 : vector<8x32xf32>
    %423 = arith.mulf %418, %422 : vector<8x32xf32>
    %424 = vector.extract_strided_slice %336 {offsets = [32, 0], sizes = [8, 128], strides = [1, 1]} : vector<64x128xf32> to vector<8x128xf32>
    %425 = arith.truncf %423 : vector<8x32xf32> to vector<8x32xbf16>
    %cst_82 = arith.constant dense<0.000000e+00> : vector<8x128xf32>
    %426 = tpu.matmul %425, %345, %cst_82 {dimension_numbers = #tpu.dot_dimension_numbers<[1], [0], [0], [1], [0, 0, 1, 1], [], []>} : vector<8x32xbf16>, vector<32x128xbf16>, vector<8x128xf32> -> vector<8x128xf32>
    %427 = arith.addf %424, %426 : vector<8x128xf32>
    %428 = arith.negf %427 : vector<8x128xf32>
    %429 = math.exp %428 : vector<8x128xf32>
    %cst_83 = arith.constant 1.000000e+00 : f32
    %430 = vector.broadcast %cst_83 : f32 to vector<8x128xf32>
    %431 = arith.addf %430, %429 : vector<8x128xf32>
    %432 = arith.divf %430, %431 : vector<8x128xf32>
    %433 = math.tanh %427 : vector<8x128xf32>
    %434 = vector.extract_strided_slice %432 {offsets = [0, 0], sizes = [8, 32], strides = [1, 1]} : vector<8x128xf32> to vector<8x32xf32>
    %435 = vector.extract_strided_slice %432 {offsets = [0, 32], sizes = [8, 32], strides = [1, 1]} : vector<8x128xf32> to vector<8x32xf32>
    %436 = vector.extract_strided_slice %433 {offsets = [0, 64], sizes = [8, 32], strides = [1, 1]} : vector<8x128xf32> to vector<8x32xf32>
    %437 = vector.extract_strided_slice %432 {offsets = [0, 96], sizes = [8, 32], strides = [1, 1]} : vector<8x128xf32> to vector<8x32xf32>
    %438 = arith.mulf %435, %421 : vector<8x32xf32>
    %439 = arith.mulf %434, %436 : vector<8x32xf32>
    %440 = arith.addf %438, %439 : vector<8x32xf32>
    %441 = math.tanh %440 : vector<8x32xf32>
    %442 = arith.mulf %437, %441 : vector<8x32xf32>
    %443 = vector.extract_strided_slice %336 {offsets = [40, 0], sizes = [8, 128], strides = [1, 1]} : vector<64x128xf32> to vector<8x128xf32>
    %444 = arith.truncf %442 : vector<8x32xf32> to vector<8x32xbf16>
    %cst_84 = arith.constant dense<0.000000e+00> : vector<8x128xf32>
    %445 = tpu.matmul %444, %345, %cst_84 {dimension_numbers = #tpu.dot_dimension_numbers<[1], [0], [0], [1], [0, 0, 1, 1], [], []>} : vector<8x32xbf16>, vector<32x128xbf16>, vector<8x128xf32> -> vector<8x128xf32>
    %446 = arith.addf %443, %445 : vector<8x128xf32>
    %447 = arith.negf %446 : vector<8x128xf32>
    %448 = math.exp %447 : vector<8x128xf32>
    %cst_85 = arith.constant 1.000000e+00 : f32
    %449 = vector.broadcast %cst_85 : f32 to vector<8x128xf32>
    %450 = arith.addf %449, %448 : vector<8x128xf32>
    %451 = arith.divf %449, %450 : vector<8x128xf32>
    %452 = math.tanh %446 : vector<8x128xf32>
    %453 = vector.extract_strided_slice %451 {offsets = [0, 0], sizes = [8, 32], strides = [1, 1]} : vector<8x128xf32> to vector<8x32xf32>
    %454 = vector.extract_strided_slice %451 {offsets = [0, 32], sizes = [8, 32], strides = [1, 1]} : vector<8x128xf32> to vector<8x32xf32>
    %455 = vector.extract_strided_slice %452 {offsets = [0, 64], sizes = [8, 32], strides = [1, 1]} : vector<8x128xf32> to vector<8x32xf32>
    %456 = vector.extract_strided_slice %451 {offsets = [0, 96], sizes = [8, 32], strides = [1, 1]} : vector<8x128xf32> to vector<8x32xf32>
    %457 = arith.mulf %454, %440 : vector<8x32xf32>
    %458 = arith.mulf %453, %455 : vector<8x32xf32>
    %459 = arith.addf %457, %458 : vector<8x32xf32>
    %460 = math.tanh %459 : vector<8x32xf32>
    %461 = arith.mulf %456, %460 : vector<8x32xf32>
    %462 = vector.extract_strided_slice %336 {offsets = [48, 0], sizes = [8, 128], strides = [1, 1]} : vector<64x128xf32> to vector<8x128xf32>
    %463 = arith.truncf %461 : vector<8x32xf32> to vector<8x32xbf16>
    %cst_86 = arith.constant dense<0.000000e+00> : vector<8x128xf32>
    %464 = tpu.matmul %463, %345, %cst_86 {dimension_numbers = #tpu.dot_dimension_numbers<[1], [0], [0], [1], [0, 0, 1, 1], [], []>} : vector<8x32xbf16>, vector<32x128xbf16>, vector<8x128xf32> -> vector<8x128xf32>
    %465 = arith.addf %462, %464 : vector<8x128xf32>
    %466 = arith.negf %465 : vector<8x128xf32>
    %467 = math.exp %466 : vector<8x128xf32>
    %cst_87 = arith.constant 1.000000e+00 : f32
    %468 = vector.broadcast %cst_87 : f32 to vector<8x128xf32>
    %469 = arith.addf %468, %467 : vector<8x128xf32>
    %470 = arith.divf %468, %469 : vector<8x128xf32>
    %471 = math.tanh %465 : vector<8x128xf32>
    %472 = vector.extract_strided_slice %470 {offsets = [0, 0], sizes = [8, 32], strides = [1, 1]} : vector<8x128xf32> to vector<8x32xf32>
    %473 = vector.extract_strided_slice %470 {offsets = [0, 32], sizes = [8, 32], strides = [1, 1]} : vector<8x128xf32> to vector<8x32xf32>
    %474 = vector.extract_strided_slice %471 {offsets = [0, 64], sizes = [8, 32], strides = [1, 1]} : vector<8x128xf32> to vector<8x32xf32>
    %475 = vector.extract_strided_slice %470 {offsets = [0, 96], sizes = [8, 32], strides = [1, 1]} : vector<8x128xf32> to vector<8x32xf32>
    %476 = arith.mulf %473, %459 : vector<8x32xf32>
    %477 = arith.mulf %472, %474 : vector<8x32xf32>
    %478 = arith.addf %476, %477 : vector<8x32xf32>
    %479 = math.tanh %478 : vector<8x32xf32>
    %480 = arith.mulf %475, %479 : vector<8x32xf32>
    %481 = vector.extract_strided_slice %336 {offsets = [56, 0], sizes = [8, 128], strides = [1, 1]} : vector<64x128xf32> to vector<8x128xf32>
    %482 = arith.truncf %480 : vector<8x32xf32> to vector<8x32xbf16>
    %cst_88 = arith.constant dense<0.000000e+00> : vector<8x128xf32>
    %483 = tpu.matmul %482, %345, %cst_88 {dimension_numbers = #tpu.dot_dimension_numbers<[1], [0], [0], [1], [0, 0, 1, 1], [], []>} : vector<8x32xbf16>, vector<32x128xbf16>, vector<8x128xf32> -> vector<8x128xf32>
    %484 = arith.addf %481, %483 : vector<8x128xf32>
    %485 = arith.negf %484 : vector<8x128xf32>
    %486 = math.exp %485 : vector<8x128xf32>
    %cst_89 = arith.constant 1.000000e+00 : f32
    %487 = vector.broadcast %cst_89 : f32 to vector<8x128xf32>
    %488 = arith.addf %487, %486 : vector<8x128xf32>
    %489 = arith.divf %487, %488 : vector<8x128xf32>
    %490 = math.tanh %484 : vector<8x128xf32>
    %491 = vector.extract_strided_slice %489 {offsets = [0, 0], sizes = [8, 32], strides = [1, 1]} : vector<8x128xf32> to vector<8x32xf32>
    %492 = vector.extract_strided_slice %489 {offsets = [0, 32], sizes = [8, 32], strides = [1, 1]} : vector<8x128xf32> to vector<8x32xf32>
    %493 = vector.extract_strided_slice %490 {offsets = [0, 64], sizes = [8, 32], strides = [1, 1]} : vector<8x128xf32> to vector<8x32xf32>
    %494 = vector.extract_strided_slice %489 {offsets = [0, 96], sizes = [8, 32], strides = [1, 1]} : vector<8x128xf32> to vector<8x32xf32>
    %495 = arith.mulf %492, %478 : vector<8x32xf32>
    %496 = arith.mulf %491, %493 : vector<8x32xf32>
    %497 = arith.addf %495, %496 : vector<8x32xf32>
    %498 = math.tanh %497 : vector<8x32xf32>
    %499 = arith.mulf %494, %498 : vector<8x32xf32>
    %c1_90 = arith.constant 1 : index
    %c0_91 = arith.constant 0 : index
    %c0_92 = arith.constant 0 : index
    %500 = vector.load %arg5[%c1_90, %c0_91, %c0_92] : memref<2x32x128xbf16, #tpu.memory_space<vmem>>, vector<1x32x128xbf16>
    %501 = vector.shape_cast %500 : vector<1x32x128xbf16> to vector<32x128xbf16>
    %cst_93 = arith.constant 0.000000e+00 : f32
    %502 = vector.broadcast %cst_93 : f32 to vector<8x32xf32>
    %cst_94 = arith.constant 0.000000e+00 : f32
    %503 = vector.broadcast %cst_94 : f32 to vector<8x32xf32>
    %504 = vector.extract_strided_slice %343 {offsets = [56, 0], sizes = [8, 128], strides = [1, 1]} : vector<64x128xf32> to vector<8x128xf32>
    %505 = arith.truncf %502 : vector<8x32xf32> to vector<8x32xbf16>
    %cst_95 = arith.constant dense<0.000000e+00> : vector<8x128xf32>
    %506 = tpu.matmul %505, %501, %cst_95 {dimension_numbers = #tpu.dot_dimension_numbers<[1], [0], [0], [1], [0, 0, 1, 1], [], []>} : vector<8x32xbf16>, vector<32x128xbf16>, vector<8x128xf32> -> vector<8x128xf32>
    %507 = arith.addf %504, %506 : vector<8x128xf32>
    %508 = arith.negf %507 : vector<8x128xf32>
    %509 = math.exp %508 : vector<8x128xf32>
    %cst_96 = arith.constant 1.000000e+00 : f32
    %510 = vector.broadcast %cst_96 : f32 to vector<8x128xf32>
    %511 = arith.addf %510, %509 : vector<8x128xf32>
    %512 = arith.divf %510, %511 : vector<8x128xf32>
    %513 = math.tanh %507 : vector<8x128xf32>
    %514 = vector.extract_strided_slice %512 {offsets = [0, 0], sizes = [8, 32], strides = [1, 1]} : vector<8x128xf32> to vector<8x32xf32>
    %515 = vector.extract_strided_slice %512 {offsets = [0, 32], sizes = [8, 32], strides = [1, 1]} : vector<8x128xf32> to vector<8x32xf32>
    %516 = vector.extract_strided_slice %513 {offsets = [0, 64], sizes = [8, 32], strides = [1, 1]} : vector<8x128xf32> to vector<8x32xf32>
    %517 = vector.extract_strided_slice %512 {offsets = [0, 96], sizes = [8, 32], strides = [1, 1]} : vector<8x128xf32> to vector<8x32xf32>
    %518 = arith.mulf %515, %503 : vector<8x32xf32>
    %519 = arith.mulf %514, %516 : vector<8x32xf32>
    %520 = arith.addf %518, %519 : vector<8x32xf32>
    %521 = math.tanh %520 : vector<8x32xf32>
    %522 = arith.mulf %517, %521 : vector<8x32xf32>
    %523 = vector.extract_strided_slice %343 {offsets = [48, 0], sizes = [8, 128], strides = [1, 1]} : vector<64x128xf32> to vector<8x128xf32>
    %524 = arith.truncf %522 : vector<8x32xf32> to vector<8x32xbf16>
    %cst_97 = arith.constant dense<0.000000e+00> : vector<8x128xf32>
    %525 = tpu.matmul %524, %501, %cst_97 {dimension_numbers = #tpu.dot_dimension_numbers<[1], [0], [0], [1], [0, 0, 1, 1], [], []>} : vector<8x32xbf16>, vector<32x128xbf16>, vector<8x128xf32> -> vector<8x128xf32>
    %526 = arith.addf %523, %525 : vector<8x128xf32>
    %527 = arith.negf %526 : vector<8x128xf32>
    %528 = math.exp %527 : vector<8x128xf32>
    %cst_98 = arith.constant 1.000000e+00 : f32
    %529 = vector.broadcast %cst_98 : f32 to vector<8x128xf32>
    %530 = arith.addf %529, %528 : vector<8x128xf32>
    %531 = arith.divf %529, %530 : vector<8x128xf32>
    %532 = math.tanh %526 : vector<8x128xf32>
    %533 = vector.extract_strided_slice %531 {offsets = [0, 0], sizes = [8, 32], strides = [1, 1]} : vector<8x128xf32> to vector<8x32xf32>
    %534 = vector.extract_strided_slice %531 {offsets = [0, 32], sizes = [8, 32], strides = [1, 1]} : vector<8x128xf32> to vector<8x32xf32>
    %535 = vector.extract_strided_slice %532 {offsets = [0, 64], sizes = [8, 32], strides = [1, 1]} : vector<8x128xf32> to vector<8x32xf32>
    %536 = vector.extract_strided_slice %531 {offsets = [0, 96], sizes = [8, 32], strides = [1, 1]} : vector<8x128xf32> to vector<8x32xf32>
    %537 = arith.mulf %534, %520 : vector<8x32xf32>
    %538 = arith.mulf %533, %535 : vector<8x32xf32>
    %539 = arith.addf %537, %538 : vector<8x32xf32>
    %540 = math.tanh %539 : vector<8x32xf32>
    %541 = arith.mulf %536, %540 : vector<8x32xf32>
    %542 = vector.extract_strided_slice %343 {offsets = [40, 0], sizes = [8, 128], strides = [1, 1]} : vector<64x128xf32> to vector<8x128xf32>
    %543 = arith.truncf %541 : vector<8x32xf32> to vector<8x32xbf16>
    %cst_99 = arith.constant dense<0.000000e+00> : vector<8x128xf32>
    %544 = tpu.matmul %543, %501, %cst_99 {dimension_numbers = #tpu.dot_dimension_numbers<[1], [0], [0], [1], [0, 0, 1, 1], [], []>} : vector<8x32xbf16>, vector<32x128xbf16>, vector<8x128xf32> -> vector<8x128xf32>
    %545 = arith.addf %542, %544 : vector<8x128xf32>
    %546 = arith.negf %545 : vector<8x128xf32>
    %547 = math.exp %546 : vector<8x128xf32>
    %cst_100 = arith.constant 1.000000e+00 : f32
    %548 = vector.broadcast %cst_100 : f32 to vector<8x128xf32>
    %549 = arith.addf %548, %547 : vector<8x128xf32>
    %550 = arith.divf %548, %549 : vector<8x128xf32>
    %551 = math.tanh %545 : vector<8x128xf32>
    %552 = vector.extract_strided_slice %550 {offsets = [0, 0], sizes = [8, 32], strides = [1, 1]} : vector<8x128xf32> to vector<8x32xf32>
    %553 = vector.extract_strided_slice %550 {offsets = [0, 32], sizes = [8, 32], strides = [1, 1]} : vector<8x128xf32> to vector<8x32xf32>
    %554 = vector.extract_strided_slice %551 {offsets = [0, 64], sizes = [8, 32], strides = [1, 1]} : vector<8x128xf32> to vector<8x32xf32>
    %555 = vector.extract_strided_slice %550 {offsets = [0, 96], sizes = [8, 32], strides = [1, 1]} : vector<8x128xf32> to vector<8x32xf32>
    %556 = arith.mulf %553, %539 : vector<8x32xf32>
    %557 = arith.mulf %552, %554 : vector<8x32xf32>
    %558 = arith.addf %556, %557 : vector<8x32xf32>
    %559 = math.tanh %558 : vector<8x32xf32>
    %560 = arith.mulf %555, %559 : vector<8x32xf32>
    %561 = vector.extract_strided_slice %343 {offsets = [32, 0], sizes = [8, 128], strides = [1, 1]} : vector<64x128xf32> to vector<8x128xf32>
    %562 = arith.truncf %560 : vector<8x32xf32> to vector<8x32xbf16>
    %cst_101 = arith.constant dense<0.000000e+00> : vector<8x128xf32>
    %563 = tpu.matmul %562, %501, %cst_101 {dimension_numbers = #tpu.dot_dimension_numbers<[1], [0], [0], [1], [0, 0, 1, 1], [], []>} : vector<8x32xbf16>, vector<32x128xbf16>, vector<8x128xf32> -> vector<8x128xf32>
    %564 = arith.addf %561, %563 : vector<8x128xf32>
    %565 = arith.negf %564 : vector<8x128xf32>
    %566 = math.exp %565 : vector<8x128xf32>
    %cst_102 = arith.constant 1.000000e+00 : f32
    %567 = vector.broadcast %cst_102 : f32 to vector<8x128xf32>
    %568 = arith.addf %567, %566 : vector<8x128xf32>
    %569 = arith.divf %567, %568 : vector<8x128xf32>
    %570 = math.tanh %564 : vector<8x128xf32>
    %571 = vector.extract_strided_slice %569 {offsets = [0, 0], sizes = [8, 32], strides = [1, 1]} : vector<8x128xf32> to vector<8x32xf32>
    %572 = vector.extract_strided_slice %569 {offsets = [0, 32], sizes = [8, 32], strides = [1, 1]} : vector<8x128xf32> to vector<8x32xf32>
    %573 = vector.extract_strided_slice %570 {offsets = [0, 64], sizes = [8, 32], strides = [1, 1]} : vector<8x128xf32> to vector<8x32xf32>
    %574 = vector.extract_strided_slice %569 {offsets = [0, 96], sizes = [8, 32], strides = [1, 1]} : vector<8x128xf32> to vector<8x32xf32>
    %575 = arith.mulf %572, %558 : vector<8x32xf32>
    %576 = arith.mulf %571, %573 : vector<8x32xf32>
    %577 = arith.addf %575, %576 : vector<8x32xf32>
    %578 = math.tanh %577 : vector<8x32xf32>
    %579 = arith.mulf %574, %578 : vector<8x32xf32>
    %580 = vector.extract_strided_slice %343 {offsets = [24, 0], sizes = [8, 128], strides = [1, 1]} : vector<64x128xf32> to vector<8x128xf32>
    %581 = arith.truncf %579 : vector<8x32xf32> to vector<8x32xbf16>
    %cst_103 = arith.constant dense<0.000000e+00> : vector<8x128xf32>
    %582 = tpu.matmul %581, %501, %cst_103 {dimension_numbers = #tpu.dot_dimension_numbers<[1], [0], [0], [1], [0, 0, 1, 1], [], []>} : vector<8x32xbf16>, vector<32x128xbf16>, vector<8x128xf32> -> vector<8x128xf32>
    %583 = arith.addf %580, %582 : vector<8x128xf32>
    %584 = arith.negf %583 : vector<8x128xf32>
    %585 = math.exp %584 : vector<8x128xf32>
    %cst_104 = arith.constant 1.000000e+00 : f32
    %586 = vector.broadcast %cst_104 : f32 to vector<8x128xf32>
    %587 = arith.addf %586, %585 : vector<8x128xf32>
    %588 = arith.divf %586, %587 : vector<8x128xf32>
    %589 = math.tanh %583 : vector<8x128xf32>
    %590 = vector.extract_strided_slice %588 {offsets = [0, 0], sizes = [8, 32], strides = [1, 1]} : vector<8x128xf32> to vector<8x32xf32>
    %591 = vector.extract_strided_slice %588 {offsets = [0, 32], sizes = [8, 32], strides = [1, 1]} : vector<8x128xf32> to vector<8x32xf32>
    %592 = vector.extract_strided_slice %589 {offsets = [0, 64], sizes = [8, 32], strides = [1, 1]} : vector<8x128xf32> to vector<8x32xf32>
    %593 = vector.extract_strided_slice %588 {offsets = [0, 96], sizes = [8, 32], strides = [1, 1]} : vector<8x128xf32> to vector<8x32xf32>
    %594 = arith.mulf %591, %577 : vector<8x32xf32>
    %595 = arith.mulf %590, %592 : vector<8x32xf32>
    %596 = arith.addf %594, %595 : vector<8x32xf32>
    %597 = math.tanh %596 : vector<8x32xf32>
    %598 = arith.mulf %593, %597 : vector<8x32xf32>
    %599 = vector.extract_strided_slice %343 {offsets = [16, 0], sizes = [8, 128], strides = [1, 1]} : vector<64x128xf32> to vector<8x128xf32>
    %600 = arith.truncf %598 : vector<8x32xf32> to vector<8x32xbf16>
    %cst_105 = arith.constant dense<0.000000e+00> : vector<8x128xf32>
    %601 = tpu.matmul %600, %501, %cst_105 {dimension_numbers = #tpu.dot_dimension_numbers<[1], [0], [0], [1], [0, 0, 1, 1], [], []>} : vector<8x32xbf16>, vector<32x128xbf16>, vector<8x128xf32> -> vector<8x128xf32>
    %602 = arith.addf %599, %601 : vector<8x128xf32>
    %603 = arith.negf %602 : vector<8x128xf32>
    %604 = math.exp %603 : vector<8x128xf32>
    %cst_106 = arith.constant 1.000000e+00 : f32
    %605 = vector.broadcast %cst_106 : f32 to vector<8x128xf32>
    %606 = arith.addf %605, %604 : vector<8x128xf32>
    %607 = arith.divf %605, %606 : vector<8x128xf32>
    %608 = math.tanh %602 : vector<8x128xf32>
    %609 = vector.extract_strided_slice %607 {offsets = [0, 0], sizes = [8, 32], strides = [1, 1]} : vector<8x128xf32> to vector<8x32xf32>
    %610 = vector.extract_strided_slice %607 {offsets = [0, 32], sizes = [8, 32], strides = [1, 1]} : vector<8x128xf32> to vector<8x32xf32>
    %611 = vector.extract_strided_slice %608 {offsets = [0, 64], sizes = [8, 32], strides = [1, 1]} : vector<8x128xf32> to vector<8x32xf32>
    %612 = vector.extract_strided_slice %607 {offsets = [0, 96], sizes = [8, 32], strides = [1, 1]} : vector<8x128xf32> to vector<8x32xf32>
    %613 = arith.mulf %610, %596 : vector<8x32xf32>
    %614 = arith.mulf %609, %611 : vector<8x32xf32>
    %615 = arith.addf %613, %614 : vector<8x32xf32>
    %616 = math.tanh %615 : vector<8x32xf32>
    %617 = arith.mulf %612, %616 : vector<8x32xf32>
    %618 = vector.extract_strided_slice %343 {offsets = [8, 0], sizes = [8, 128], strides = [1, 1]} : vector<64x128xf32> to vector<8x128xf32>
    %619 = arith.truncf %617 : vector<8x32xf32> to vector<8x32xbf16>
    %cst_107 = arith.constant dense<0.000000e+00> : vector<8x128xf32>
    %620 = tpu.matmul %619, %501, %cst_107 {dimension_numbers = #tpu.dot_dimension_numbers<[1], [0], [0], [1], [0, 0, 1, 1], [], []>} : vector<8x32xbf16>, vector<32x128xbf16>, vector<8x128xf32> -> vector<8x128xf32>
    %621 = arith.addf %618, %620 : vector<8x128xf32>
    %622 = arith.negf %621 : vector<8x128xf32>
    %623 = math.exp %622 : vector<8x128xf32>
    %cst_108 = arith.constant 1.000000e+00 : f32
    %624 = vector.broadcast %cst_108 : f32 to vector<8x128xf32>
    %625 = arith.addf %624, %623 : vector<8x128xf32>
    %626 = arith.divf %624, %625 : vector<8x128xf32>
    %627 = math.tanh %621 : vector<8x128xf32>
    %628 = vector.extract_strided_slice %626 {offsets = [0, 0], sizes = [8, 32], strides = [1, 1]} : vector<8x128xf32> to vector<8x32xf32>
    %629 = vector.extract_strided_slice %626 {offsets = [0, 32], sizes = [8, 32], strides = [1, 1]} : vector<8x128xf32> to vector<8x32xf32>
    %630 = vector.extract_strided_slice %627 {offsets = [0, 64], sizes = [8, 32], strides = [1, 1]} : vector<8x128xf32> to vector<8x32xf32>
    %631 = vector.extract_strided_slice %626 {offsets = [0, 96], sizes = [8, 32], strides = [1, 1]} : vector<8x128xf32> to vector<8x32xf32>
    %632 = arith.mulf %629, %615 : vector<8x32xf32>
    %633 = arith.mulf %628, %630 : vector<8x32xf32>
    %634 = arith.addf %632, %633 : vector<8x32xf32>
    %635 = math.tanh %634 : vector<8x32xf32>
    %636 = arith.mulf %631, %635 : vector<8x32xf32>
    %637 = vector.extract_strided_slice %343 {offsets = [0, 0], sizes = [8, 128], strides = [1, 1]} : vector<64x128xf32> to vector<8x128xf32>
    %638 = arith.truncf %636 : vector<8x32xf32> to vector<8x32xbf16>
    %cst_109 = arith.constant dense<0.000000e+00> : vector<8x128xf32>
    %639 = tpu.matmul %638, %501, %cst_109 {dimension_numbers = #tpu.dot_dimension_numbers<[1], [0], [0], [1], [0, 0, 1, 1], [], []>} : vector<8x32xbf16>, vector<32x128xbf16>, vector<8x128xf32> -> vector<8x128xf32>
    %640 = arith.addf %637, %639 : vector<8x128xf32>
    %641 = arith.negf %640 : vector<8x128xf32>
    %642 = math.exp %641 : vector<8x128xf32>
    %cst_110 = arith.constant 1.000000e+00 : f32
    %643 = vector.broadcast %cst_110 : f32 to vector<8x128xf32>
    %644 = arith.addf %643, %642 : vector<8x128xf32>
    %645 = arith.divf %643, %644 : vector<8x128xf32>
    %646 = math.tanh %640 : vector<8x128xf32>
    %647 = vector.extract_strided_slice %645 {offsets = [0, 0], sizes = [8, 32], strides = [1, 1]} : vector<8x128xf32> to vector<8x32xf32>
    %648 = vector.extract_strided_slice %645 {offsets = [0, 32], sizes = [8, 32], strides = [1, 1]} : vector<8x128xf32> to vector<8x32xf32>
    %649 = vector.extract_strided_slice %646 {offsets = [0, 64], sizes = [8, 32], strides = [1, 1]} : vector<8x128xf32> to vector<8x32xf32>
    %650 = vector.extract_strided_slice %645 {offsets = [0, 96], sizes = [8, 32], strides = [1, 1]} : vector<8x128xf32> to vector<8x32xf32>
    %651 = arith.mulf %648, %634 : vector<8x32xf32>
    %652 = arith.mulf %647, %649 : vector<8x32xf32>
    %653 = arith.addf %651, %652 : vector<8x32xf32>
    %654 = math.tanh %653 : vector<8x32xf32>
    %655 = arith.mulf %650, %654 : vector<8x32xf32>
    %656 = tpu.concatenate %366, %385, %404, %423, %442, %461, %480, %499 in 0 : vector<8x32xf32>, vector<8x32xf32>, vector<8x32xf32>, vector<8x32xf32>, vector<8x32xf32>, vector<8x32xf32>, vector<8x32xf32>, vector<8x32xf32> -> vector<64x32xf32>
    %657 = tpu.concatenate %655, %636, %617, %598, %579, %560, %541, %522 in 0 : vector<8x32xf32>, vector<8x32xf32>, vector<8x32xf32>, vector<8x32xf32>, vector<8x32xf32>, vector<8x32xf32>, vector<8x32xf32>, vector<8x32xf32> -> vector<64x32xf32>
    %658 = tpu.concatenate %656, %657 in 1 : vector<64x32xf32>, vector<64x32xf32> -> vector<64x64xf32>
    %659 = vector.extract_strided_slice %658 {offsets = [56, 0], sizes = [8, 64], strides = [1, 1]} : vector<64x64xf32> to vector<8x64xf32>
    %c0_111 = arith.constant 0 : index
    %c0_112 = arith.constant 0 : index
    %660 = vector.load %arg7[%c0_111, %c0_112] : memref<64x8xf32, #tpu.memory_space<vmem>>, vector<64x8xf32>
    %cst_113 = arith.constant dense<0.000000e+00> : vector<8x8xf32>
    %661 = tpu.matmul %659, %660, %cst_113 {dimension_numbers = #tpu.dot_dimension_numbers<[1], [0], [0], [1], [0, 0, 1, 1], [], []>} : vector<8x64xf32>, vector<64x8xf32>, vector<8x8xf32> -> vector<8x8xf32>
    %c0_114 = arith.constant 0 : index
    %c0_115 = arith.constant 0 : index
    %662 = vector.load %arg8[%c0_114, %c0_115] : memref<1x8xf32, #tpu.memory_space<vmem>>, vector<1x8xf32>
    %663 = vector.broadcast %662 : vector<1x8xf32> to vector<8x8xf32>
    %664 = arith.addf %661, %663 : vector<8x8xf32>
    %c0_116 = arith.constant 0 : index
    %c0_117 = arith.constant 0 : index
    %665 = vector.load %arg9[%c0_116, %c0_117] : memref<8x8xf32, #tpu.memory_space<vmem>>, vector<8x8xf32>
    tpu.vector_store %arg9[%c0_116, %c0_117], %664 {strides = array<i32>} : memref<8x8xf32, #tpu.memory_space<vmem>>, vector<8x8xf32>,
    return
  }
}

</mosaic_0001>

<bundles_post_ra>
// kernel: tpu_custom_call.1
= control target key start
LH: loop header
LB: loop body
LE: loop exit
PB: predicated region body
PF: predicated region fallthrough
CT: control target
= control target key end

     0   :  { %14 = vsyncpa [#allocation3], 0  ;;  %s4282_s0 = inlined_call_operand.vmem [shape: f32[64,32], index: 0, kind: input, shape index: {}]   ;;  %s4283_s1 = inlined_call_operand.hbm [shape: f32[2,32,128], index: 1, kind: input, shape index: {}]   ;;  %s4284_s2 = inlined_call_operand.vmem [shape: bf16[2,32,128], index: 2, kind: input, shape index: {}]   ;;  %s4285_s3 = inlined_call_operand.vmem [shape: f32[2,1,128], index: 3, kind: input, shape index: {}]   ;;  %s4286_s4 = inlined_call_operand.vmem [shape: f32[2,64,128], index: 4, kind: input, shape index: {}]   ;;  %s4287_s5 = inlined_call_operand.hbm [shape: bf16[2,32,128], index: 5, kind: input, shape index: {}]   ;;  %s4288_s6 = inlined_call_operand.vmem [shape: f32[2,1,128], index: 6, kind: input, shape index: {}]   ;;  %s4289_s7 = inlined_call_operand.vmem [shape: f32[64,8], index: 7, kind: input, shape index: {}]   ;;  %s4290_s8 = inlined_call_operand.vmem [shape: f32[1,8], index: 8, kind: input, shape index: {}]   ;;  %s4291_s9 = inlined_call_operand.hbm [shape: f32[8,8], index: 9, kind: output, shape index: {}]  }
   0x1   :  { %15 = vsyncpa [#allocation6], 0 }
   0x2   :  { %16 = vsyncpa [#allocation4], 0  ;;  %s3530_s30 = smov [#allocation2]   ;;  %s3458_s13 = scalar_lea.hbm %s4283_s1, 1024 }
   0x3   :  { %s24_s10 = sshll.u32 %s3530_s30, 4  ;;  %p3459_p0 = scmp.ne.s32.totalorder %s4283_s1, %s3458_s13  ;;  %s25_s10 = int_to_ptr.vmem [resolvable:$true] %s24_s10 }
   0x4   :  { %p3462_p1 = scmp.lt.u32.totalorder %s3458_s13, %s4283_s1 }
   0x6   :  { %p3464_p2 = pnand %p3462_p1, %p3459_p0 }
   0x8   :  { %3467 = shalt.err (!%p3464_p2)
}
   0x9   :  { %s3468_s18 = scalar_lea.vmem %s25_s10, 1024  ;;  %p3473_p4 = scmp.lt.s32.totalorder %s25_s10, %s25_s10 }
   0xa   :  { %p3469_p3 = scmp.ne.s32.totalorder %s25_s10, %s3468_s18  ;;  %p3474_p5 = scmp.lt.s32.totalorder %s3468_s18, %s3468_s18 }
   0xc   :  { %p3475_p6 = por %p3474_p5, %p3473_p4 }
   0xe   :  { %p3476_p7 = pnand %p3475_p6, %p3469_p3 }
  0x10   :  { %3479 = shalt.err (!%p3476_p7)
}
  0x11   :  { %s3531_s19 = smov 128   ;;  %s3532_s20 = smov 8  }
  0x12   :  { %30 = dma.hbm_to_vmem [thread:$0]  %s4283_s1, 1024, %s25_s10, [#allocation3], %s3531_s19, %s3531_s19, %s3532_s20  }
  0x13   :  { %s3533_s23 = smov [#allocation5]   ;;  %s3480_s27 = scalar_lea.hbm %s4287_s5, 512 }
  0x14   :  { %s42_s24 = sshll.u32 %s3533_s23, 4  ;;  %p3481_p8 = scmp.ne.s32.totalorder %s4287_s5, %s3480_s27  ;;  %s43_s24 = int_to_ptr.vmem [resolvable:$true] %s42_s24 }
  0x15   :  { %p3484_p9 = scmp.lt.u32.totalorder %s3480_s27, %s4287_s5 }
  0x17   :  { %p3486_p10 = pnand %p3484_p9, %p3481_p8 }
  0x19   :  { %3489 = shalt.err (!%p3486_p10)
}
  0x1a   :  { %s3490_s12 = scalar_lea.vmem %s43_s24, 512  ;;  %p3495_p12 = scmp.lt.s32.totalorder %s43_s24, %s43_s24 }
  0x1b   :  { %p3491_p11 = scmp.ne.s32.totalorder %s43_s24, %s3490_s12  ;;  %p3496_p13 = scmp.lt.s32.totalorder %s3490_s12, %s3490_s12 }
  0x1d   :  { %p3497_p0 = por %p3496_p13, %p3495_p12 }
  0x1f   :  { %p3498_p1 = pnand %p3497_p0, %p3491_p11 }
  0x21   :  { %3501 = shalt.err (!%p3498_p1)
}
  0x22   :  { %s3534_s1 = smov 64   ;;  %s3535_s10 = smov 4  }
  0x23   :  { %48 = dma.hbm_to_vmem [thread:$0]  %s4287_s5, 512, %s43_s24, [#allocation6], %s3534_s1, %s3534_s1, %s3535_s10  }
  0x24   :  { %3524 = dma.done.wait [#allocation3], 1024  }
  0x25   :  { %3525 = vsyncadd [#allocation3], 4294966272 }
  0x26   :  { %3526 = dma.done.wait [#allocation6], 512  }
  0x27   :  { %3527 = vsyncadd [#allocation6], 4294966784  ;;  %vm81_vm0 = vcmask 261120   ;;  %v70_v0 = vld [vmem:[#allocation2] sm:$0xff]  ;;  %v71_v1 = vld [vmem:[#allocation2 + $0x8] sm:$0xff]  ;;  %v3536_v10 = vmov 0.0  }
  0x28   :  { %v72_v2 = vld [vmem:[#allocation2 + $0x10] sm:$0xff]  ;;  %v3178_v3 = vpack.c.bf16 %v71_v1, %v70_v0  ;;  %v73_v4 = vld [vmem:[#allocation2 + $0x18] sm:$0xff]  ;;  %v62_v5 = vld [vmem:[%s4282_s0] sm:$0xff]  ;;  %vm3537_vm1 = vmmov 0   ;;  %v3538_v17 = vmov 0   ;;  %s3539_s14 = smov 32  }
  0x29   :  { %v3182_v6 = vpack.c.bf16 %v73_v4, %v72_v2  ;;  %2871 = vmatprep.mubr.msk.f32.mxu0 %vm81_vm0, %v62_v5  ;;  %2891 = vmatprep.mubr.msk.f32.mxu1 %vm81_vm0, %v62_v5  ;;  %v3626_v7 = vld [vmem:[%s4282_s0 + $0x8] sm:$0xff]  ;;  %v3631_v8 = vld [vmem:[%s4284_s2] sm:$0xff]   ;;  %v3636_v9 = vld [vmem:[%s4282_s0 + $0x10] sm:$0xff]  ;;  %vm1590_vm2 = vcmask 523264   ;;  %vm2599_vm3 = vcmask 64512  }
  0x2a   :  { %3179 = vmatprep.subr.bf16.mxu0 %v3178_v3  ;;  %v3647_v11 = vld [vmem:[%s4282_s0 + $0x18] sm:$0xff]  ;;  %v3652_v12 = vld [vmem:[%s4284_s2 + $0x8] sm:$0xff]   ;;  %v3657_v13 = vld [vmem:[%s4282_s0 + $0x20] sm:$0xff] }
  0x2b   :  { %3181 = vmatpush3.bf16.msra.mxu0 %v3178_v3  ;;  %v3667_v14 = vld [vmem:[%s4282_s0 + $0x28] sm:$0xff]  ;;  %v3673_v15 = vld [vmem:[%s4282_s0 + $0x30] sm:$0xff]  ;;  %v3683_v16 = vld [vmem:[%s4282_s0 + $0x38] sm:$0xff] }
  0x2c   :  { %3183 = vmatprep.subr.bf16.mxu0 %v3182_v6  ;;  %v2617_v18 = vld [vmem:[%s4285_s3] ss:$0 sm:$0xff]  ;;  %v213_v51 = vld [vmem:[#allocation2 + $0x28] sm:$0xff]  ;;  %v214_v52 = vld [vmem:[#allocation2 + $0x30] sm:$0xff] }
  0x2d   :  { %v212_v50 = vld [vmem:[#allocation2 + $0x20] sm:$0xff]  ;;  %v215_v54 = vld [vmem:[#allocation2 + $0x38] sm:$0xff] }
  0x2e   :  { %v3186_v53 = vpack.c.bf16 %v213_v51, %v212_v50  ;;  %v3190_v55 = vpack.c.bf16 %v215_v54, %v214_v52  ;;  %v3748_v60 = vld [vmem:[%s4285_s3 + $0x1] ss:$0 sm:$0xff] }
  0x2f   :  { %3185 = vmatpush3.bf16.msra.mxu0 %v3182_v6 }
  0x30   :  { %2903 = vmatprep.subr.bf16.mxu0 %v3536_v10  ;;  %3187 = vmatprep.subr.bf16.mxu1 %v3186_v53 }
  0x31   :  { %3189 = vmatpush3.bf16.msra.mxu1 %v3186_v53 }
  0x32   :  { %2872 = vmatmul.mubr.msk.f32.vlgmr.msra.gmra.mrb[0].mxu0 %vm81_vm0, %v3626_v7  ;;  %3191 = vmatprep.subr.bf16.mxu1 %v3190_v55 }
  0x33   :  { %2904 = vmatpush3.bf16.msra.mxu0 %v3631_v8  ;;  %2874 = vmatprep.mubr.msk.f32.mxu0 %vm81_vm0, %v3636_v9 }
  0x34   :  { %2905 = vmatprep.subr.bf16.mxu0 %v3536_v10 }
  0x35   :  { %3193 = vmatpush3.bf16.msra.mxu1 %v3190_v55 }
  0x36   :  { %2875 = vmatmul.mubr.msk.f32.gmra.mrb[2].mxu0 %vm81_vm0, %v3647_v11  ;;  %2911 = vmatprep.subr.bf16.mxu1 %v3536_v10 }
  0x37   :  { %2877 = vmatprep.mubr.msk.f32.mxu0 %vm81_vm0, %v3657_v13  ;;  %2906 = vmatpush3.bf16.msra.mxu0 %v3652_v12 }
  0x38   :  { %2919 = vmatprep.subr.bf16.mxu0 %v3536_v10  ;;  %2892 = vmatmul.mubr.msk.f32.vlgmr.msra.gmra.mrb[0].mxu1 %vm81_vm0, %v3626_v7 }
  0x39   :  { %2912 = vmatpush3.bf16.msra.mxu1 %v3631_v8  ;;  %2894 = vmatprep.mubr.msk.f32.mxu1 %vm81_vm0, %v3636_v9 }
  0x3a   :  { %2878 = vmatmul.mubr.msk.f32.gmra.mrb[4].mxu0 %vm81_vm0, %v3667_v14  ;;  %2913 = vmatprep.subr.bf16.mxu1 %v3536_v10 }
  0x3b   :  { %2880 = vmatprep.mubr.msk.f32.mxu0 %vm81_vm0, %v3673_v15 }
  0x3c   :  { %2895 = vmatmul.mubr.msk.f32.gmra.mrb[2].mxu1 %vm81_vm0, %v3647_v11 }
  0x3d   :  { %2897 = vmatprep.mubr.msk.f32.mxu1 %vm81_vm0, %v3657_v13  ;;  %2914 = vmatpush3.bf16.msra.mxu1 %v3652_v12 }
  0x3e   :  { %2881 = vmatmul.mubr.msk.f32.gmra.mrb[6].mxu0 %vm81_vm0, %v3683_v16  ;;  %2927 = vmatprep.subr.bf16.mxu1 %v3536_v10 }
  0x3f   :  { %2907 = vmatprep.mubr.msk.bf16.mxu0 %vm3537_vm1, %v3536_v10 }
  0x40   :  { %2898 = vmatmul.mubr.msk.f32.gmra.mrb[4].mxu1 %vm81_vm0, %v3667_v14 }
  0x41   :  { %2900 = vmatprep.mubr.msk.f32.mxu1 %vm81_vm0, %v3673_v15 }
  0x42   :  { %2908 = vmatmul.mubr.bf16.vlgmr.msra.gmra.mrb[8].mxu0 %v3538_v17 }
  0x43   :  { %2920 = vmatpush3.bf16.msra.mxu0 %v3631_v8  ;;  %2923 = vmatprep.mubr.msk.bf16.mxu0 %vm3537_vm1, %v3536_v10 }
  0x44   :  { %2921 = vmatprep.subr.bf16.mxu0 %v3536_v10  ;;  %2901 = vmatmul.mubr.msk.f32.gmra.mrb[6].mxu1 %vm81_vm0, %v3683_v16 }
  0x45   :  { %2915 = vmatprep.mubr.msk.bf16.mxu1 %vm3537_vm1, %v3536_v10 }
  0x47   :  { %2922 = vmatpush3.bf16.msra.mxu0 %v3652_v12 }
  0x48   :  { %2935 = vmatprep.subr.bf16.mxu0 %v3536_v10 }
 0x105   :  { %v2873_v19 = vpop.f32.mrb[0].mxu0 }
 0x106   :  { %v3699_v20 = vadd.f32 %v2873_v19, %v2617_v18  ;;  %v172_v21 = vpop.f32.mrb[1].mxu0 }
 0x107   :  { %v173_v34 = vadd.f32 %v2617_v18, %v172_v21 }
 0x109   :  { %v2876_v22 = vpop.f32.mrb[2].mxu0 }
 0x10a   :  { %v3701_v23 = vadd.f32 %v2876_v22, %v2617_v18  ;;  %v182_v24 = vpop.f32.mrb[3].mxu0 }
 0x10b   :  { %v3703_v25 = vadd.f32 %v2617_v18, %v182_v24  ;;  %v2893_v61 = vpop.f32.mrb[0].mxu1 }
 0x10c   :  { %v3751_v62 = vadd.f32 %v2893_v61, %v3748_v60  ;;  %v290_v63 = vpop.f32.mrb[1].mxu1 }
 0x10d   :  { %v2879_v26 = vpop.f32.mrb[4].mxu0  ;;  %v3754_v0 = vadd.f32 %v3748_v60, %v290_v63 }
 0x10e   :  { %v3705_v27 = vadd.f32 %v2879_v26, %v2617_v18  ;;  %v192_v28 = vpop.f32.mrb[5].mxu0 }
 0x10f   :  { %v3707_v29 = vadd.f32 %v2617_v18, %v192_v28  ;;  %v2896_v1 = vpop.f32.mrb[2].mxu1 }
 0x110   :  { %v3757_v2 = vadd.f32 %v2896_v1, %v3748_v60  ;;  %v300_v3 = vpop.f32.mrb[3].mxu1 }
 0x111   :  { %v2882_v30 = vpop.f32.mrb[6].mxu0  ;;  %v3760_v4 = vadd.f32 %v3748_v60, %v300_v3 }
 0x112   :  { %v3709_v31 = vadd.f32 %v2882_v30, %v2617_v18  ;;  %v202_v32 = vpop.f32.mrb[7].mxu0 }
 0x113   :  { %v3711_v33 = vadd.f32 %v2617_v18, %v202_v32  ;;  %v2899_v5 = vpop.f32.mrb[4].mxu1 }
 0x114   :  { %v3763_v6 = vadd.f32 %v2899_v5, %v3748_v60  ;;  %v310_v7 = vpop.f32.mrb[5].mxu1 }
 0x115   :  { %v382_v35 = vpop.f32.mrb[8].mxu0  ;;  %v3766_v9 = vadd.f32 %v3748_v60, %v310_v7 }
 0x116   :  { %v388_v36 = vadd.f32 %v382_v35, %v173_v34  ;;  %v2909_v37 = vpop.f32.mrb[9].mxu0 }
 0x117   :  { %v385_v38 = vpop.f32.mrb[10].mxu0  ;;  %v3768_v11 = vpop.f32.mrb[6].mxu1 }
 0x118   :  { %v2910_v39 = vpop.f32.mrb[11].mxu0  ;;  %3258 = vtanh.f32 %v388_v36  ;;  %v2638_v41 = vmul.f32 -1.442695, %v388_v36  ;;  %v320_v13 = vpop.f32.mrb[7].mxu1 }
 0x119   :  { %v3771_v14 = vadd.f32 %v3748_v60, %v320_v13 }
 0x11a   :  { %3260 = vpow2.f32 %v2638_v41 }
 0x122   :  { %v3259_v40 = vpop.eup %3258 }
 0x123   :  { %398 = vrot.lane.b32.xlu0 %v3259_v40, %s3534_s1 }
 0x124   :  { %v3261_v42 = vpop.eup %3260 }
 0x125   :  { %v392_v43 = vadd.f32 1.0, %v3261_v42 }
 0x127   :  { %3262 = vrcp.f32 %v392_v43 }
 0x131   :  { %v3263_v44 = vpop.eup %3262 }
 0x132   :  { %v396_v47 = vmul.f32 0.0, %v3263_v44 }
 0x195   :  { %v399_v45 = vpop.permute.xlu0 %398 }
 0x196   :  { %v401_v46 = vmul.f32 %v3263_v44, %v399_v45 }
 0x198   :  { %403 = vrot.lane.b32.xlu0 %v401_v46, %s3539_s14 }
 0x20a   :  { %v404_v48 = vpop.permute.xlu0 %403 }
 0x20b   :  { %v3715_v49 = vadd.f32 %v404_v48, %v396_v47 }
 0x20d   :  { %3264 = vtanh.f32 %v3715_v49 }
 0x217   :  { %v3265_v56 = vpop.eup %3264 }
 0x218   :  { %409 = vrot.lane.b32.xlu1 %v3265_v56, %s3534_s1 }
 0x28a   :  { %v410_v57 = vpop.permute.xlu1 %409 }
 0x28b   :  { %v3740_v58 = vmul.f32 %v3263_v44, %v410_v57 }
 0x28d   :  { %v413_v59 = vpack.c.bf16 %v3740_v58, %v3740_v58 }
 0x28f   :  { %415 = vrot.lane.b32.xlu1 %v413_v59, %s3539_s14 }
 0x301   :  { %v416_v15 = vpop.permute.xlu1 %415 }
 0x302   :  { %2916 = vmatmul.mubr.msk.bf16.vlgmr.msra.gmra.mrb[8].mxu1 %vm81_vm0, %v416_v15 }
 0x303   :  { %2928 = vmatpush3.bf16.msra.mxu1 %v3631_v8  ;;  %2931 = vmatprep.mubr.msk.bf16.mxu1 %vm3537_vm1, %v3536_v10 }
 0x304   :  { %2929 = vmatprep.subr.bf16.mxu1 %v3536_v10 }
 0x307   :  { %2930 = vmatpush3.bf16.msra.mxu1 %v3652_v12 }
 0x308   :  { %2943 = vmatprep.subr.bf16.mxu1 %v3536_v10 }
 0x3d5   :  { %v454_v16 = vpop.f32.mrb[8].mxu1 }
 0x3d6   :  { %v460_v18 = vadd.f32 %v454_v16, %v3699_v20  ;;  %v2917_v19 = vpop.f32.mrb[9].mxu1 }
 0x3d7   :  { %v457_v21 = vpop.f32.mrb[10].mxu1 }
 0x3d8   :  { %3266 = vtanh.f32 %v460_v18  ;;  %v2918_v22 = vpop.f32.mrb[11].mxu1  ;;  %v2640_v26 = vmul.f32 -1.442695, %v460_v18 }
 0x3da   :  { %3268 = vpow2.f32 %v2640_v26 }
 0x3e2   :  { %v3267_v24 = vpop.eup %3266 }
 0x3e3   :  { %470 = vrot.lane.b32.xlu0 %v3267_v24, %s3534_s1 }
 0x3e4   :  { %v3269_v28 = vpop.eup %3268 }
 0x3e5   :  { %v464_v30 = vadd.f32 1.0, %v3269_v28 }
 0x3e7   :  { %3270 = vrcp.f32 %v464_v30 }
 0x3f1   :  { %v3271_v32 = vpop.eup %3270 }
 0x3f2   :  { %v468_v36 = vmul.f32 %v3271_v32, %v3715_v49 }
 0x455   :  { %v471_v34 = vpop.permute.xlu0 %470 }
 0x456   :  { %v473_v35 = vmul.f32 %v3271_v32, %v471_v34 }
 0x458   :  { %475 = vrot.lane.b32.xlu1 %v473_v35, %s3539_s14 }
 0x4ca   :  { %v476_v20 = vpop.permute.xlu1 %475 }
 0x4cb   :  { %v478_v37 = vadd.f32 %v476_v20, %v468_v36 }
 0x4cd   :  { %3272 = vtanh.f32 %v478_v37 }
 0x4d7   :  { %v3273_v38 = vpop.eup %3272 }
 0x4d8   :  { %481 = vrot.lane.b32.xlu0 %v3273_v38, %s3534_s1 }
 0x54a   :  { %v482_v39 = vpop.permute.xlu0 %481 }
 0x54b   :  { %v3785_v40 = vmul.f32 %v3271_v32, %v482_v39 }
 0x54d   :  { %v485_v41 = vpack.c.bf16 %v3785_v40, %v3785_v40 }
 0x54f   :  { %487 = vrot.lane.b32.xlu1 %v485_v41, %s3539_s14 }
 0x5c1   :  { %v488_v42 = vpop.permute.xlu1 %487 }
 0x5c2   :  { %2924 = vmatmul.mubr.msk.bf16.vlgmr.msra.gmra.mrb[12].mxu0 %vm81_vm0, %v488_v42 }
 0x5c3   :  { %2936 = vmatpush3.bf16.msra.mxu0 %v3631_v8  ;;  %2939 = vmatprep.mubr.msk.bf16.mxu0 %vm3537_vm1, %v3536_v10 }
 0x5c4   :  { %2937 = vmatprep.subr.bf16.mxu0 %v3536_v10 }
 0x5c7   :  { %2938 = vmatpush3.bf16.msra.mxu0 %v3652_v12 }
 0x5c8   :  { %2951 = vmatprep.subr.bf16.mxu0 %v3536_v10 }
 0x695   :  { %v526_v43 = vpop.f32.mrb[12].mxu0 }
 0x696   :  { %v532_v44 = vadd.f32 %v526_v43, %v3703_v25  ;;  %v2925_v45 = vpop.f32.mrb[13].mxu0 }
 0x697   :  { %v529_v46 = vpop.f32.mrb[14].mxu0 }
 0x698   :  { %3274 = vtanh.f32 %v532_v44  ;;  %v2926_v47 = vpop.f32.mrb[15].mxu0  ;;  %v2642_v49 = vmul.f32 -1.442695, %v532_v44 }
 0x69a   :  { %3276 = vpow2.f32 %v2642_v49 }
 0x6a2   :  { %v3275_v48 = vpop.eup %3274 }
 0x6a3   :  { %542 = vrot.lane.b32.xlu0 %v3275_v48, %s3534_s1 }
 0x6a4   :  { %v3277_v50 = vpop.eup %3276 }
 0x6a5   :  { %v536_v51 = vadd.f32 1.0, %v3277_v50 }
 0x6a7   :  { %3278 = vrcp.f32 %v536_v51 }
 0x6b1   :  { %v3279_v52 = vpop.eup %3278 }
 0x6b2   :  { %v540_v55 = vmul.f32 %v3279_v52, %v478_v37 }
 0x715   :  { %v543_v53 = vpop.permute.xlu0 %542 }
 0x716   :  { %v545_v54 = vmul.f32 %v3279_v52, %v543_v53 }
 0x718   :  { %547 = vrot.lane.b32.xlu1 %v545_v54, %s3539_s14 }
 0x78a   :  { %v548_v56 = vpop.permute.xlu1 %547 }
 0x78b   :  { %v550_v25 = vadd.f32 %v548_v56, %v540_v55 }
 0x78d   :  { %3280 = vtanh.f32 %v550_v25 }
 0x797   :  { %v3281_v57 = vpop.eup %3280 }
 0x798   :  { %553 = vrot.lane.b32.xlu0 %v3281_v57, %s3534_s1 }
 0x80a   :  { %v554_v59 = vpop.permute.xlu0 %553 }
 0x80b   :  { %v3801_v61 = vmul.f32 %v3279_v52, %v554_v59 }
 0x80d   :  { %v557_v63 = vpack.c.bf16 %v3801_v61, %v3801_v61 }
 0x80f   :  { %559 = vrot.lane.b32.xlu1 %v557_v63, %s3539_s14 }
 0x881   :  { %v560_v1 = vpop.permute.xlu1 %559 }
 0x882   :  { %2932 = vmatmul.mubr.msk.bf16.vlgmr.msra.gmra.mrb[12].mxu1 %vm81_vm0, %v560_v1 }
 0x883   :  { %2944 = vmatpush3.bf16.msra.mxu1 %v3631_v8  ;;  %2947 = vmatprep.mubr.msk.bf16.mxu1 %vm3537_vm1, %v3536_v10 }
 0x884   :  { %2945 = vmatprep.subr.bf16.mxu1 %v3536_v10 }
 0x887   :  { %2946 = vmatpush3.bf16.msra.mxu1 %v3652_v12 }
 0x888   :  { %2959 = vmatprep.subr.bf16.mxu1 %v3536_v10 }
 0x955   :  { %v598_v3 = vpop.f32.mrb[12].mxu1 }
 0x956   :  { %v604_v5 = vadd.f32 %v598_v3, %v3701_v23  ;;  %v2933_v7 = vpop.f32.mrb[13].mxu1 }
 0x957   :  { %v601_v13 = vpop.f32.mrb[14].mxu1 }
 0x958   :  { %3282 = vtanh.f32 %v604_v5  ;;  %v2934_v15 = vpop.f32.mrb[15].mxu1  ;;  %v2644_v18 = vmul.f32 -1.442695, %v604_v5 }
 0x95a   :  { %3284 = vpow2.f32 %v2644_v18 }
 0x962   :  { %v3283_v16 = vpop.eup %3282 }
 0x963   :  { %614 = vrot.lane.b32.xlu0 %v3283_v16, %s3534_s1 }
 0x964   :  { %v3285_v19 = vpop.eup %3284 }
 0x965   :  { %v608_v21 = vadd.f32 1.0, %v3285_v19 }
 0x967   :  { %3286 = vrcp.f32 %v608_v21 }
 0x971   :  { %v3287_v22 = vpop.eup %3286 }
 0x972   :  { %v612_v28 = vmul.f32 %v3287_v22, %v550_v25 }
 0x9d5   :  { %v615_v24 = vpop.permute.xlu0 %614 }
 0x9d6   :  { %v617_v26 = vmul.f32 %v3287_v22, %v615_v24 }
 0x9d8   :  { %619 = vrot.lane.b32.xlu1 %v617_v26, %s3539_s14  ;;  %v3857_v26 = vld [vmem:[%s4284_s2 + $0x10] sm:$0xff]  }
 0xa4a   :  { %v620_v30 = vpop.permute.xlu1 %619 }
 0xa4b   :  { %v622_v23 = vadd.f32 %v620_v30, %v612_v28  ;;  %v3864_v30 = vld [vmem:[%s4284_s2 + $0x18] sm:$0xff]  }
 0xa4d   :  { %3288 = vtanh.f32 %v622_v23 }
 0xa57   :  { %v3289_v32 = vpop.eup %3288 }
 0xa58   :  { %625 = vrot.lane.b32.xlu0 %v3289_v32, %s3534_s1 }
 0xaca   :  { %v626_v34 = vpop.permute.xlu0 %625 }
 0xacb   :  { %v3817_v35 = vmul.f32 %v3287_v22, %v626_v34 }
 0xacd   :  { %v629_v36 = vpack.c.bf16 %v3817_v35, %v3817_v35 }
 0xacf   :  { %631 = vrot.lane.b32.xlu1 %v629_v36, %s3539_s14 }
 0xb41   :  { %v632_v20 = vpop.permute.xlu1 %631 }
 0xb42   :  { %2940 = vmatmul.mubr.msk.bf16.vlgmr.msra.gmra.mrb[16].mxu0 %vm81_vm0, %v632_v20 }
 0xb43   :  { %2952 = vmatpush3.bf16.msra.mxu0 %v3631_v8  ;;  %2955 = vmatprep.mubr.msk.bf16.mxu0 %vm3537_vm1, %v3536_v10 }
 0xb44   :  { %2953 = vmatprep.subr.bf16.mxu0 %v3536_v10 }
 0xb47   :  { %2954 = vmatpush3.bf16.msra.mxu0 %v3652_v12 }
 0xb48   :  { %2967 = vmatprep.subr.bf16.mxu0 %v3536_v10 }
 0xc15   :  { %v670_v37 = vpop.f32.mrb[16].mxu0 }
 0xc16   :  { %v676_v38 = vadd.f32 %v670_v37, %v3707_v29  ;;  %v2941_v39 = vpop.f32.mrb[17].mxu0  ;;  %v326_v37 = vadd.f32 %v3768_v11, %v3748_v60 }
 0xc17   :  { %v673_v41 = vpop.f32.mrb[18].mxu0 }
 0xc18   :  { %3290 = vtanh.f32 %v676_v38  ;;  %v2942_v42 = vpop.f32.mrb[19].mxu0  ;;  %v2646_v44 = vmul.f32 -1.442695, %v676_v38 }
 0xc1a   :  { %3292 = vpow2.f32 %v2646_v44 }
 0xc22   :  { %v3291_v43 = vpop.eup %3290 }
 0xc23   :  { %686 = vrot.lane.b32.xlu0 %v3291_v43, %s3534_s1 }
 0xc24   :  { %v3293_v45 = vpop.eup %3292 }
 0xc25   :  { %v680_v46 = vadd.f32 1.0, %v3293_v45 }
 0xc27   :  { %3294 = vrcp.f32 %v680_v46 }
 0xc31   :  { %v3295_v47 = vpop.eup %3294 }
 0xc32   :  { %v684_v50 = vmul.f32 %v3295_v47, %v622_v23 }
 0xc95   :  { %v687_v48 = vpop.permute.xlu0 %686 }
 0xc96   :  { %v689_v49 = vmul.f32 %v3295_v47, %v687_v48 }
 0xc98   :  { %691 = vrot.lane.b32.xlu1 %v689_v49, %s3539_s14 }
 0xd0a   :  { %v692_v51 = vpop.permute.xlu1 %691 }
 0xd0b   :  { %v694_v29 = vadd.f32 %v692_v51, %v684_v50 }
 0xd0d   :  { %3296 = vtanh.f32 %v694_v29 }
 0xd17   :  { %v3297_v52 = vpop.eup %3296 }
 0xd18   :  { %697 = vrot.lane.b32.xlu0 %v3297_v52, %s3534_s1 }
 0xd8a   :  { %v698_v53 = vpop.permute.xlu0 %697 }
 0xd8b   :  { %v3833_v54 = vmul.f32 %v3295_v47, %v698_v53 }
 0xd8d   :  { %v701_v55 = vpack.c.bf16 %v3833_v54, %v3833_v54 }
 0xd8f   :  { %703 = vrot.lane.b32.xlu1 %v701_v55, %s3539_s14 }
 0xe01   :  { %v704_v56 = vpop.permute.xlu1 %703 }
 0xe02   :  { %2948 = vmatmul.mubr.msk.bf16.vlgmr.msra.gmra.mrb[16].mxu1 %vm81_vm0, %v704_v56 }
 0xe03   :  { %2960 = vmatpush3.bf16.msra.mxu1 %v3631_v8  ;;  %2963 = vmatprep.mubr.msk.bf16.mxu1 %vm3537_vm1, %v3536_v10 }
 0xe04   :  { %2961 = vmatprep.subr.bf16.mxu1 %v3536_v10 }
 0xe07   :  { %2962 = vmatpush3.bf16.msra.mxu1 %v3652_v12 }
 0xe08   :  { %2975 = vmatprep.subr.bf16.mxu1 %v3536_v10 }
 0xed5   :  { %v742_v25 = vpop.f32.mrb[16].mxu1 }
 0xed6   :  { %v748_v57 = vadd.f32 %v742_v25, %v3705_v27  ;;  %v2949_v59 = vpop.f32.mrb[17].mxu1 }
 0xed7   :  { %v745_v63 = vpop.f32.mrb[18].mxu1 }
 0xed8   :  { %3298 = vtanh.f32 %v748_v57  ;;  %v2950_v1 = vpop.f32.mrb[19].mxu1  ;;  %v2648_v8 = vmul.f32 -1.442695, %v748_v57 }
 0xeda   :  { %3300 = vpow2.f32 %v2648_v8 }
 0xee2   :  { %v3299_v3 = vpop.eup %3298 }
 0xee3   :  { %758 = vrot.lane.b32.xlu0 %v3299_v3, %s3534_s1 }
 0xee4   :  { %v3301_v5 = vpop.eup %3300 }
 0xee5   :  { %v752_v7 = vadd.f32 1.0, %v3301_v5 }
 0xee7   :  { %3302 = vrcp.f32 %v752_v7 }
 0xef1   :  { %v3303_v13 = vpop.eup %3302 }
 0xef2   :  { %v756_v16 = vmul.f32 %v3303_v13, %v694_v29 }
 0xf55   :  { %v759_v15 = vpop.permute.xlu0 %758 }
 0xf56   :  { %v761_v12 = vmul.f32 %v3303_v13, %v759_v15 }
 0xf58   :  { %763 = vrot.lane.b32.xlu1 %v761_v12, %s3539_s14 }
 0xfca   :  { %v764_v18 = vpop.permute.xlu1 %763 }
 0xfcb   :  { %v766_v27 = vadd.f32 %v764_v18, %v756_v16 }
 0xfcd   :  { %3304 = vtanh.f32 %v766_v27 }
 0xfd7   :  { %v3305_v19 = vpop.eup %3304 }
 0xfd8   :  { %769 = vrot.lane.b32.xlu0 %v3305_v19, %s3534_s1 }
0x104a   :  { %v770_v21 = vpop.permute.xlu0 %769 }
0x104b   :  { %v3849_v22 = vmul.f32 %v3303_v13, %v770_v21 }
0x104d   :  { %v773_v24 = vpack.c.bf16 %v3849_v22, %v3849_v22 }
0x104f   :  { %775 = vrot.lane.b32.xlu1 %v773_v24, %s3539_s14 }
0x10c1   :  { %v776_v28 = vpop.permute.xlu1 %775 }
0x10c2   :  { %2956 = vmatmul.mubr.msk.bf16.vlgmr.msra.gmra.mrb[20].mxu0 %vm81_vm0, %v776_v28 }
0x10c3   :  { %2968 = vmatpush3.bf16.msra.mxu0 %v3857_v26  ;;  %2971 = vmatprep.mubr.msk.bf16.mxu0 %vm3537_vm1, %v3536_v10 }
0x10c4   :  { %2969 = vmatprep.subr.bf16.mxu0 %v3536_v10 }
0x10c7   :  { %2970 = vmatpush3.bf16.msra.mxu0 %v3864_v30 }
0x10c8   :  { %2983 = vmatprep.subr.bf16.mxu0 %v3536_v10 }
0x10ca   :  { %2972 = vmatmul.mubr.bf16.vlgmr.msra.gmra.mrb[24].mxu0 %v3538_v17 }
0x10cb   :  { %2984 = vmatpush3.bf16.msra.mxu0 %v3857_v26  ;;  %2987 = vmatprep.mubr.msk.bf16.mxu0 %vm3537_vm1, %v3536_v10 }
0x10cc   :  { %2985 = vmatprep.subr.bf16.mxu0 %v3536_v10 }
0x10cf   :  { %2986 = vmatpush3.bf16.msra.mxu0 %v3864_v30 }
0x10d0   :  { %2999 = vmatprep.subr.bf16.mxu0 %v3536_v10 }
0x1195   :  { %v814_v23 = vpop.f32.mrb[20].mxu0 }
0x1196   :  { %v820_v32 = vadd.f32 %v814_v23, %v3711_v33  ;;  %v2957_v34 = vpop.f32.mrb[21].mxu0 }
0x1197   :  { %v817_v36 = vpop.f32.mrb[22].mxu0 }
0x1198   :  { %3306 = vtanh.f32 %v820_v32  ;;  %v2958_v20 = vpop.f32.mrb[23].mxu0  ;;  %v2650_v33 = vmul.f32 -1.442695, %v820_v32 }
0x119d   :  { %v968_v38 = vpop.f32.mrb[24].mxu0 }
0x119e   :  { %v974_v39 = vadd.f32 %v968_v38, %v326_v37  ;;  %v2973_v41 = vpop.f32.mrb[25].mxu0 }
0x119f   :  { %v971_v42 = vpop.f32.mrb[26].mxu0 }
0x11a0   :  { %3308 = vtanh.f32 %v974_v39  ;;  %v2974_v43 = vpop.f32.mrb[27].mxu0  ;;  %v2659_v46 = vmul.f32 -1.442695, %v974_v39 }
0x11a1   :  { %3310 = vpow2.f32 %v2650_v33 }
0x11a2   :  { %v3307_v44 = vpop.eup %3306  ;;  %3312 = vpow2.f32 %v2659_v46 }
0x11a3   :  { %830 = vrot.lane.b32.xlu0 %v3307_v44, %s3534_s1 }
0x11aa   :  { %v3309_v45 = vpop.eup %3308 }
0x11ab   :  { %984 = vrot.lane.b32.xlu1 %v3309_v45, %s3534_s1  ;;  %v3311_v47 = vpop.eup %3310 }
0x11ac   :  { %v824_v48 = vadd.f32 1.0, %v3311_v47  ;;  %v3313_v60 = vpop.eup %3312 }
0x11ad   :  { %v978_v11 = vadd.f32 1.0, %v3313_v60 }
0x11ae   :  { %3314 = vrcp.f32 %v824_v48 }
0x11af   :  { %3316 = vrcp.f32 %v978_v11 }
0x11b8   :  { %v3315_v49 = vpop.eup %3314 }
0x11b9   :  { %v3317_v29 = vpop.eup %3316  ;;  %v828_v55 = vmul.f32 %v3315_v49, %v766_v27 }
0x11ba   :  { %v982_v57 = vmul.f32 0.0, %v3317_v29 }
0x1215   :  { %v831_v50 = vpop.permute.xlu0 %830 }
0x1216   :  { %v833_v51 = vmul.f32 %v3315_v49, %v831_v50 }
0x1218   :  { %835 = vrot.lane.b32.xlu0 %v833_v51, %s3539_s14 }
0x121d   :  { %v985_v52 = vpop.permute.xlu1 %984 }
0x121e   :  { %v987_v53 = vmul.f32 %v3317_v29, %v985_v52 }
0x1220   :  { %989 = vrot.lane.b32.xlu1 %v987_v53, %s3539_s14 }
0x128a   :  { %v836_v56 = vpop.permute.xlu0 %835 }
0x128b   :  { %v3885_v25 = vadd.f32 %v836_v56, %v828_v55 }
0x128d   :  { %3318 = vtanh.f32 %v3885_v25 }
0x1292   :  { %v990_v59 = vpop.permute.xlu1 %989 }
0x1293   :  { %v992_v63 = vadd.f32 %v990_v59, %v982_v57 }
0x1295   :  { %3320 = vtanh.f32 %v992_v63 }
0x1297   :  { %v3319_v1 = vpop.eup %3318 }
0x1298   :  { %841 = vrot.lane.b32.xlu0 %v3319_v1, %s3534_s1 }
0x129f   :  { %v3321_v3 = vpop.eup %3320 }
0x12a0   :  { %995 = vrot.lane.b32.xlu1 %v3321_v3, %s3534_s1 }
0x130a   :  { %v842_v8 = vpop.permute.xlu0 %841 }
0x130b   :  { %v3890_v5 = vmul.f32 %v3315_v49, %v842_v8 }
0x130d   :  { %v845_v7 = vpack.c.bf16 %v3890_v5, %v3890_v5 }
0x130f   :  { %847 = vrot.lane.b32.xlu0 %v845_v7, %s3539_s14 }
0x1312   :  { %v996_v13 = vpop.permute.xlu1 %995 }
0x1313   :  { %v3895_v15 = vmul.f32 %v3317_v29, %v996_v13 }
0x1315   :  { %v999_v12 = vpack.c.bf16 %v3895_v15, %v3895_v15 }
0x1317   :  { %1001 = vrot.lane.b32.xlu1 %v999_v12, %s3539_s14 }
0x1381   :  { %v848_v16 = vpop.permute.xlu0 %847 }
0x1382   :  { %2964 = vmatmul.mubr.msk.bf16.vlgmr.msra.gmra.mrb[20].mxu1 %vm81_vm0, %v848_v16 }
0x1383   :  { %2976 = vmatpush3.bf16.msra.mxu1 %v3857_v26  ;;  %2979 = vmatprep.mubr.msk.bf16.mxu1 %vm3537_vm1, %v3536_v10 }
0x1384   :  { %2977 = vmatprep.subr.bf16.mxu1 %v3536_v10 }
0x1387   :  { %2978 = vmatpush3.bf16.msra.mxu1 %v3864_v30 }
0x1388   :  { %2991 = vmatprep.subr.bf16.mxu1 %v3536_v10 }
0x1389   :  { %v1002_v18 = vpop.permute.xlu1 %1001 }
0x138a   :  { %2980 = vmatmul.mubr.msk.bf16.vlgmr.msra.gmra.mrb[24].mxu1 %vm81_vm0, %v1002_v18 }
0x138b   :  { %2992 = vmatpush3.bf16.msra.mxu1 %v3857_v26  ;;  %2995 = vmatprep.mubr.msk.bf16.mxu1 %vm3537_vm1, %v3536_v10 }
0x138c   :  { %2993 = vmatprep.subr.bf16.mxu1 %v3536_v10 }
0x138f   :  { %2994 = vmatpush3.bf16.msra.mxu1 %v3864_v30 }
0x1390   :  { %3007 = vmatprep.subr.bf16.mxu1 %v3536_v10 }
0x1455   :  { %v886_v27 = vpop.f32.mrb[20].mxu1 }
0x1456   :  { %v3915_v19 = vadd.f32 %v886_v27, %v3709_v31  ;;  %v2965_v21 = vpop.f32.mrb[21].mxu1 }
0x1457   :  { %v889_v24 = vpop.f32.mrb[22].mxu1 }
0x1458   :  { %v2966_v28 = vpop.f32.mrb[23].mxu1 }
0x145d   :  { %v1040_v23 = vpop.f32.mrb[24].mxu1 }
0x145e   :  { %v1046_v32 = vadd.f32 %v1040_v23, %v3771_v14  ;;  %v2981_v34 = vpop.f32.mrb[25].mxu1 }
0x145f   :  { %v1043_v36 = vpop.f32.mrb[26].mxu1 }
0x1460   :  { %3322 = vtanh.f32 %v1046_v32  ;;  %v2982_v20 = vpop.f32.mrb[27].mxu1  ;;  %v2661_v38 = vmul.f32 -1.442695, %v1046_v32 }
0x1462   :  { %3324 = vpow2.f32 %v2661_v38 }
0x146a   :  { %v3323_v37 = vpop.eup %3322 }
0x146b   :  { %1056 = vrot.lane.b32.xlu0 %v3323_v37, %s3534_s1 }
0x146c   :  { %v3325_v39 = vpop.eup %3324 }
0x146d   :  { %v1050_v41 = vadd.f32 1.0, %v3325_v39 }
0x146f   :  { %3326 = vrcp.f32 %v1050_v41 }
0x1479   :  { %v3327_v31 = vpop.eup %3326 }
0x147a   :  { %v1054_v44 = vmul.f32 %v3327_v31, %v992_v63 }
0x14dd   :  { %v1057_v42 = vpop.permute.xlu0 %1056 }
0x14de   :  { %v1059_v43 = vmul.f32 %v3327_v31, %v1057_v42 }
0x14e0   :  { %1061 = vrot.lane.b32.xlu1 %v1059_v43, %s3539_s14 }
0x1552   :  { %v1062_v45 = vpop.permute.xlu1 %1061 }
0x1553   :  { %v1064_v14 = vadd.f32 %v1062_v45, %v1054_v44 }
0x1555   :  { %3328 = vtanh.f32 %v1064_v14 }
0x155f   :  { %v3329_v33 = vpop.eup %3328 }
0x1560   :  { %1067 = vrot.lane.b32.xlu0 %v3329_v33, %s3534_s1 }
0x15d2   :  { %v1068_v46 = vpop.permute.xlu0 %1067 }
0x15d3   :  { %v3921_v47 = vmul.f32 %v3327_v31, %v1068_v46 }
0x15d5   :  { %v1071_v48 = vpack.c.bf16 %v3921_v47, %v3921_v47 }
0x15d7   :  { %1073 = vrot.lane.b32.xlu1 %v1071_v48, %s3539_s14 }
0x1649   :  { %v1074_v60 = vpop.permute.xlu1 %1073 }
0x164a   :  { %2988 = vmatmul.mubr.msk.bf16.vlgmr.msra.gmra.mrb[28].mxu0 %vm81_vm0, %v1074_v60 }
0x164b   :  { %3000 = vmatpush3.bf16.msra.mxu0 %v3857_v26  ;;  %3003 = vmatprep.mubr.msk.bf16.mxu0 %vm3537_vm1, %v3536_v10 }
0x164c   :  { %3001 = vmatprep.subr.bf16.mxu0 %v3536_v10 }
0x164f   :  { %3002 = vmatpush3.bf16.msra.mxu0 %v3864_v30 }
0x1650   :  { %3015 = vmatprep.subr.bf16.mxu0 %v3536_v10 }
0x171d   :  { %v1112_v11 = vpop.f32.mrb[28].mxu0 }
0x171e   :  { %v1118_v49 = vadd.f32 %v1112_v11, %v3763_v6  ;;  %v2989_v50 = vpop.f32.mrb[29].mxu0 }
0x171f   :  { %v1115_v51 = vpop.f32.mrb[30].mxu0 }
0x1720   :  { %3330 = vtanh.f32 %v1118_v49  ;;  %v2990_v29 = vpop.f32.mrb[31].mxu0  ;;  %v2663_v53 = vmul.f32 -1.442695, %v1118_v49 }
0x1722   :  { %3332 = vpow2.f32 %v2663_v53 }
0x172a   :  { %v3331_v52 = vpop.eup %3330 }
0x172b   :  { %1128 = vrot.lane.b32.xlu0 %v3331_v52, %s3534_s1 }
0x172c   :  { %v3333_v55 = vpop.eup %3332 }
0x172d   :  { %v1122_v56 = vadd.f32 1.0, %v3333_v55 }
0x172f   :  { %3334 = vrcp.f32 %v1122_v56 }
0x1739   :  { %v3335_v57 = vpop.eup %3334 }
0x173a   :  { %v1126_v1 = vmul.f32 %v3335_v57, %v1064_v14 }
0x179d   :  { %v1129_v59 = vpop.permute.xlu0 %1128 }
0x179e   :  { %v1131_v63 = vmul.f32 %v3335_v57, %v1129_v59 }
0x17a0   :  { %1133 = vrot.lane.b32.xlu1 %v1131_v63, %s3539_s14 }
0x1812   :  { %v1134_v3 = vpop.permute.xlu1 %1133 }
0x1813   :  { %v1136_v6 = vadd.f32 %v1134_v3, %v1126_v1 }
0x1815   :  { %3336 = vtanh.f32 %v1136_v6 }
0x181f   :  { %v3337_v8 = vpop.eup %3336 }
0x1820   :  { %1139 = vrot.lane.b32.xlu0 %v3337_v8, %s3534_s1 }
0x1892   :  { %v1140_v7 = vpop.permute.xlu0 %1139 }
0x1893   :  { %v3937_v13 = vmul.f32 %v3335_v57, %v1140_v7 }
0x1895   :  { %v1143_v12 = vpack.c.bf16 %v3937_v13, %v3937_v13 }
0x1897   :  { %1145 = vrot.lane.b32.xlu1 %v1143_v12, %s3539_s14 }
0x1909   :  { %v1146_v16 = vpop.permute.xlu1 %1145 }
0x190a   :  { %2996 = vmatmul.mubr.msk.bf16.vlgmr.msra.gmra.mrb[28].mxu1 %vm81_vm0, %v1146_v16 }
0x190b   :  { %3008 = vmatpush3.bf16.msra.mxu1 %v3857_v26  ;;  %3011 = vmatprep.mubr.msk.bf16.mxu1 %vm3537_vm1, %v3536_v10 }
0x190c   :  { %3009 = vmatprep.subr.bf16.mxu1 %v3536_v10 }
0x190f   :  { %3010 = vmatpush3.bf16.msra.mxu1 %v3864_v30 }
0x1910   :  { %3023 = vmatprep.subr.bf16.mxu1 %v3536_v10 }
0x19dd   :  { %v1184_v18 = vpop.f32.mrb[28].mxu1 }
0x19de   :  { %v1190_v27 = vadd.f32 %v1184_v18, %v3766_v9  ;;  %v2997_v21 = vpop.f32.mrb[29].mxu1 }
0x19df   :  { %v1187_v24 = vpop.f32.mrb[30].mxu1 }
0x19e0   :  { %3338 = vtanh.f32 %v1190_v27  ;;  %v2998_v28 = vpop.f32.mrb[31].mxu1  ;;  %v2665_v32 = vmul.f32 -1.442695, %v1190_v27 }
0x19e2   :  { %3340 = vpow2.f32 %v2665_v32 }
0x19ea   :  { %v3339_v23 = vpop.eup %3338 }
0x19eb   :  { %1200 = vrot.lane.b32.xlu0 %v3339_v23, %s3534_s1 }
0x19ec   :  { %v3341_v34 = vpop.eup %3340 }
0x19ed   :  { %v1194_v36 = vadd.f32 1.0, %v3341_v34 }
0x19ef   :  { %3342 = vrcp.f32 %v1194_v36 }
0x19f9   :  { %v3343_v20 = vpop.eup %3342 }
0x19fa   :  { %v1198_v39 = vmul.f32 %v3343_v20, %v1136_v6 }
0x1a5d   :  { %v1201_v37 = vpop.permute.xlu0 %1200 }
0x1a5e   :  { %v1203_v38 = vmul.f32 %v3343_v20, %v1201_v37 }
0x1a60   :  { %1205 = vrot.lane.b32.xlu1 %v1203_v38, %s3539_s14 }
0x1ad2   :  { %v1206_v41 = vpop.permute.xlu1 %1205 }
0x1ad3   :  { %v1208_v9 = vadd.f32 %v1206_v41, %v1198_v39 }
0x1ad5   :  { %3344 = vtanh.f32 %v1208_v9 }
0x1adf   :  { %v3345_v31 = vpop.eup %3344 }
0x1ae0   :  { %1211 = vrot.lane.b32.xlu0 %v3345_v31, %s3534_s1 }
0x1b52   :  { %v1212_v42 = vpop.permute.xlu0 %1211 }
0x1b53   :  { %v3953_v43 = vmul.f32 %v3343_v20, %v1212_v42 }
0x1b55   :  { %v1215_v44 = vpack.c.bf16 %v3953_v43, %v3953_v43 }
0x1b57   :  { %1217 = vrot.lane.b32.xlu1 %v1215_v44, %s3539_s14 }
0x1bc9   :  { %v1218_v45 = vpop.permute.xlu1 %1217 }
0x1bca   :  { %3004 = vmatmul.mubr.msk.bf16.vlgmr.msra.gmra.mrb[32].mxu0 %vm81_vm0, %v1218_v45 }
0x1bcb   :  { %3016 = vmatpush3.bf16.msra.mxu0 %v3857_v26  ;;  %3019 = vmatprep.mubr.msk.bf16.mxu0 %vm3537_vm1, %v3536_v10 }
0x1bcc   :  { %3017 = vmatprep.subr.bf16.mxu0 %v3536_v10 }
0x1bcf   :  { %3018 = vmatpush3.bf16.msra.mxu0 %v3864_v30 }
0x1c9d   :  { %v1256_v14 = vpop.f32.mrb[32].mxu0 }
0x1c9e   :  { %v1262_v33 = vadd.f32 %v1256_v14, %v3757_v2  ;;  %v3005_v46 = vpop.f32.mrb[33].mxu0 }
0x1c9f   :  { %v1259_v48 = vpop.f32.mrb[34].mxu0 }
0x1ca0   :  { %3346 = vtanh.f32 %v1262_v33  ;;  %v3006_v60 = vpop.f32.mrb[35].mxu0  ;;  %v2667_v49 = vmul.f32 -1.442695, %v1262_v33 }
0x1ca2   :  { %3348 = vpow2.f32 %v2667_v49 }
0x1caa   :  { %v3347_v11 = vpop.eup %3346 }
0x1cab   :  { %1272 = vrot.lane.b32.xlu0 %v3347_v11, %s3534_s1 }
0x1cac   :  { %v3349_v50 = vpop.eup %3348 }
0x1cad   :  { %v1266_v51 = vadd.f32 1.0, %v3349_v50 }
0x1caf   :  { %3350 = vrcp.f32 %v1266_v51 }
0x1cb9   :  { %v3351_v29 = vpop.eup %3350 }
0x1cba   :  { %v1270_v55 = vmul.f32 %v3351_v29, %v1208_v9 }
0x1d1d   :  { %v1273_v52 = vpop.permute.xlu0 %1272 }
0x1d1e   :  { %v1275_v53 = vmul.f32 %v3351_v29, %v1273_v52 }
0x1d20   :  { %1277 = vrot.lane.b32.xlu1 %v1275_v53, %s3539_s14 }
0x1d92   :  { %v1278_v56 = vpop.permute.xlu1 %1277 }
0x1d93   :  { %v1280_v2 = vadd.f32 %v1278_v56, %v1270_v55  ;;  %v2652_v55 = vmul.f32 -1.442695, %v3915_v19 }
0x1d95   :  { %3352 = vtanh.f32 %v1280_v2 }
0x1d9f   :  { %v3353_v57 = vpop.eup %3352 }
0x1da0   :  { %1283 = vrot.lane.b32.xlu0 %v3353_v57, %s3534_s1 }
0x1e12   :  { %v1284_v59 = vpop.permute.xlu0 %1283 }
0x1e13   :  { %v3968_v63 = vmul.f32 %v3351_v29, %v1284_v59 }
0x1e15   :  { %v1287_v1 = vpack.c.bf16 %v3968_v63, %v3968_v63 }
0x1e17   :  { %1289 = vrot.lane.b32.xlu1 %v1287_v1, %s3539_s14 }
0x1e89   :  { %v1290_v3 = vpop.permute.xlu1 %1289 }
0x1e8a   :  { %3012 = vmatmul.mubr.msk.bf16.vlgmr.msra.gmra.mrb[32].mxu1 %vm81_vm0, %v1290_v3 }
0x1e8b   :  { %3024 = vmatpush3.bf16.msra.mxu1 %v3857_v26  ;;  %3027 = vmatprep.mubr.msk.bf16.mxu1 %vm3537_vm1, %v3536_v10 }
0x1e8c   :  { %3025 = vmatprep.subr.bf16.mxu1 %v3536_v10 }
0x1e8f   :  { %3026 = vmatpush3.bf16.msra.mxu1 %v3864_v30 }
0x1f5d   :  { %v1328_v6 = vpop.f32.mrb[32].mxu1 }
0x1f5e   :  { %v1334_v8 = vadd.f32 %v1328_v6, %v3760_v4  ;;  %v3013_v7 = vpop.f32.mrb[33].mxu1 }
0x1f5f   :  { %v1331_v12 = vpop.f32.mrb[34].mxu1 }
0x1f60   :  { %3354 = vtanh.f32 %v1334_v8  ;;  %v3014_v16 = vpop.f32.mrb[35].mxu1  ;;  %v2669_v27 = vmul.f32 -1.442695, %v1334_v8 }
0x1f62   :  { %3356 = vpow2.f32 %v2669_v27 }
0x1f6a   :  { %v3355_v18 = vpop.eup %3354 }
0x1f6b   :  { %1344 = vrot.lane.b32.xlu0 %v3355_v18, %s3534_s1 }
0x1f6c   :  { %v3357_v26 = vpop.eup %3356 }
0x1f6d   :  { %v1338_v21 = vadd.f32 1.0, %v3357_v26 }
0x1f6f   :  { %3358 = vrcp.f32 %v1338_v21 }
0x1f79   :  { %v3359_v24 = vpop.eup %3358 }
0x1f7a   :  { %v1342_v30 = vmul.f32 %v3359_v24, %v1280_v2 }
0x1fdd   :  { %v1345_v28 = vpop.permute.xlu0 %1344 }
0x1fde   :  { %v1347_v23 = vmul.f32 %v3359_v24, %v1345_v28 }
0x1fe0   :  { %1349 = vrot.lane.b32.xlu1 %v1347_v23, %s3539_s14 }
0x2052   :  { %v1350_v32 = vpop.permute.xlu1 %1349 }
0x2053   :  { %v1352_v4 = vadd.f32 %v1350_v32, %v1342_v30 }
0x2055   :  { %3360 = vtanh.f32 %v1352_v4 }
0x205f   :  { %v3361_v34 = vpop.eup %3360 }
0x2060   :  { %1355 = vrot.lane.b32.xlu0 %v3361_v34, %s3534_s1 }
0x20d2   :  { %v1356_v36 = vpop.permute.xlu0 %1355 }
0x20d3   :  { %v1358_v20 = vmul.f32 %v3359_v24, %v1356_v36  ;;  %v1575_v36 = vld [vmem:[%s4286_s4] sm:$0xff] }
0x20d5   :  { %v1359_v37 = vpack.c.bf16 %v1358_v20, %v1358_v20 }
0x20d7   :  { %1361 = vrot.lane.b32.xlu1 %v1359_v37, %s3539_s14 }
0x2149   :  { %v1362_v38 = vpop.permute.xlu1 %1361 }
0x214a   :  { %3020 = vmatmul.mubr.msk.bf16.vlgmr.msra.gmra.mrb[36].mxu0 %vm81_vm0, %v1362_v38 }
0x221d   :  { %v1400_v39 = vpop.f32.mrb[36].mxu0 }
0x221e   :  { %v1406_v41 = vadd.f32 %v1400_v39, %v3751_v62  ;;  %v3021_v9 = vpop.f32.mrb[37].mxu0 }
0x221f   :  { %v1403_v31 = vpop.f32.mrb[38].mxu0  ;;  %v2686_v9 = vld [vmem:[%s4286_s4 + $0x58] sm:$0xff] }
0x2220   :  { %3362 = vtanh.f32 %v1406_v41  ;;  %v3022_v42 = vpop.f32.mrb[39].mxu0  ;;  %v2671_v45 = vmul.f32 -1.442695, %v1406_v41  ;;  %v2685_v41 = vld [vmem:[%s4286_s4 + $0x50] sm:$0xff]  ;;  %v1579_v31 = vld [vmem:[%s4286_s4 + $0x20] sm:$0xff] }
0x2221   :  { %v3214_v42 = vpack.c.bf16 %v2686_v9, %v2685_v41 }
0x2222   :  { %3364 = vpow2.f32 %v2671_v45  ;;  %v2688_v45 = vld [vmem:[%s4286_s4 + $0x68] sm:$0xff] }
0x222a   :  { %v3363_v44 = vpop.eup %3362 }
0x222b   :  { %1416 = vrot.lane.b32.xlu0 %v3363_v44, %s3534_s1  ;;  %v2687_v44 = vld [vmem:[%s4286_s4 + $0x60] sm:$0xff] }
0x222c   :  { %v3365_v14 = vpop.eup %3364 }
0x222d   :  { %v1410_v33 = vadd.f32 1.0, %v3365_v14 }
0x222f   :  { %3366 = vrcp.f32 %v1410_v33  ;;  %v3218_v33 = vpack.c.bf16 %v2688_v45, %v2687_v44 }
0x2239   :  { %v3367_v46 = vpop.eup %3366 }
0x223a   :  { %v1414_v11 = vmul.f32 %v3367_v46, %v1352_v4 }
0x229d   :  { %v1417_v48 = vpop.permute.xlu0 %1416 }
0x229e   :  { %v1419_v60 = vmul.f32 %v3367_v46, %v1417_v48  ;;  %v1582_v48 = vld [vmem:[%s4286_s4 + $0x38] sm:$0xff] }
0x22a0   :  { %1421 = vrot.lane.b32.xlu1 %v1419_v60, %s3539_s14  ;;  %v2689_v60 = vld [vmem:[%s4286_s4 + $0x70] sm:$0xff] }
0x2312   :  { %v1422_v49 = vpop.permute.xlu1 %1421 }
0x2313   :  { %v1424_v62 = vadd.f32 %v1422_v49, %v1414_v11  ;;  %v2690_v11 = vld [vmem:[%s4286_s4 + $0x78] sm:$0xff] }
0x2315   :  { %3368 = vtanh.f32 %v1424_v62 }
0x2316   :  { %3370 = vtanh.f32 %v3915_v19 }
0x2317   :  { %3372 = vpow2.f32 %v2652_v55 }
0x231f   :  { %v3369_v50 = vpop.eup %3368 }
0x2320   :  { %1427 = vrot.lane.b32.xlu0 %v3369_v50, %s3534_s1  ;;  %v3371_v53 = vpop.eup %3370 }
0x2321   :  { %v3373_v56 = vpop.eup %3372 }
0x2322   :  { %v896_v2 = vadd.f32 1.0, %v3373_v56 }
0x2324   :  { %3374 = vrcp.f32 %v896_v2 }
0x232e   :  { %v3994_v59 = vpop.eup %3374 }
0x232f   :  { %v900_v6 = vmul.f32 %v3994_v59, %v3885_v25 }
0x2392   :  { %v1428_v51 = vpop.permute.xlu0 %1427 }
0x2393   :  { %v1430_v29 = vmul.f32 %v3367_v46, %v1428_v51  ;;  %v1581_v46 = vld [vmem:[%s4286_s4 + $0x30] sm:$0xff] }
0x2394   :  { %v3206_v49 = vpack.c.bf16 %v1582_v48, %v1581_v46 }
0x2395   :  { %v1431_v52 = vpack.c.bf16 %v1430_v29, %v1430_v29 }
0x2397   :  { %1433 = vrot.lane.b32.xlu1 %v1431_v52, %s3539_s14 }
0x239b   :  { %902 = vrot.lane.b32.xlu1 %v3371_v53, %s3534_s1 }
0x2409   :  { %v1434_v57 = vpop.permute.xlu1 %1433 }
0x240a   :  { %3028 = vmatmul.mubr.msk.bf16.vlgmr.msra.gmra.mrb[36].mxu1 %vm81_vm0, %v1434_v57 }
0x240d   :  { %v903_v1 = vpop.permute.xlu1 %902 }
0x240e   :  { %v905_v3 = vmul.f32 %v3994_v59, %v903_v1 }
0x2410   :  { %907 = vrot.lane.b32.xlu1 %v905_v3, %s3539_s14  ;;  %v4090_v3 = vld [vmem:[#allocation5] sm:$0xff]  }
0x2482   :  { %v908_v8 = vpop.permute.xlu1 %907 }
0x2483   :  { %v910_v7 = vadd.f32 %v908_v8, %v900_v6  ;;  %v4101_v8 = vld [vmem:[#allocation5 + $0x8] sm:$0xff]  }
0x2485   :  { %3376 = vtanh.f32 %v910_v7 }
0x248f   :  { %v3377_v19 = vpop.eup %3376 }
0x2490   :  { %913 = vrot.lane.b32.xlu1 %v3377_v19, %s3534_s1 }
0x2494   :  { %1545 = vrot.lane.b32.xlu1 %v1430_v29, %s3534_s1 }
0x2498   :  { %1547 = vrot.lane.b32.xlu1 %v1358_v20, %s3534_s1  ;;  %v1576_v20 = vld [vmem:[%s4286_s4 + $0x8] sm:$0xff] }
0x2499   :  { %v3194_v37 = vpack.c.bf16 %v1576_v20, %v1575_v36 }
0x249b   :  { %3195 = vmatprep.subr.bf16.mxu0 %v3194_v37 }
0x249c   :  { %1549 = vrot.lane.b32.xlu1 %v3968_v63, %s3534_s1  ;;  %3197 = vmatpush3.bf16.msra.mxu0 %v3194_v37 }
0x24dd   :  { %v1472_v12 = vpop.f32.mrb[36].mxu1 }
0x24de   :  { %v1478_v16 = vadd.f32 %v1472_v12, %v3754_v0  ;;  %v3029_v18 = vpop.f32.mrb[37].mxu1 }
0x24df   :  { %v1475_v27 = vpop.f32.mrb[38].mxu1 }
0x24e0   :  { %3378 = vtanh.f32 %v1478_v16  ;;  %v3030_v25 = vpop.f32.mrb[39].mxu1  ;;  %v2673_v21 = vmul.f32 -1.442695, %v1478_v16 }
0x24e2   :  { %3380 = vpow2.f32 %v2673_v21 }
0x24ea   :  { %v3379_v26 = vpop.eup %3378 }
0x24eb   :  { %1488 = vrot.lane.b32.xlu0 %v3379_v26, %s3534_s1 }
0x24ec   :  { %v3381_v24 = vpop.eup %3380 }
0x24ed   :  { %v1482_v28 = vadd.f32 1.0, %v3381_v24 }
0x24ef   :  { %3382 = vrcp.f32 %v1482_v28  ;;  %v2674_v28 = vld [vmem:[%s4288_s6] ss:$0 sm:$0xff] }
0x24f9   :  { %v4007_v23 = vpop.eup %3382 }
0x24fa   :  { %v1486_v0 = vmul.f32 %v4007_v23, %v1424_v62  ;;  %v3222_v62 = vpack.c.bf16 %v2690_v11, %v2689_v60 }
0x255d   :  { %v1489_v30 = vpop.permute.xlu0 %1488 }
0x255e   :  { %v1491_v63 = vmul.f32 %v4007_v23, %v1489_v30 }
0x2560   :  { %1493 = vrot.lane.b32.xlu0 %v1491_v63, %s3539_s14 }
0x25d2   :  { %v1494_v32 = vpop.permute.xlu0 %1493 }
0x25d3   :  { %v1496_v4 = vadd.f32 %v1494_v32, %v1486_v0 }
0x25d5   :  { %3384 = vtanh.f32 %v1496_v4 }
0x25df   :  { %v3385_v34 = vpop.eup %3384 }
0x25e0   :  { %1499 = vrot.lane.b32.xlu0 %v3385_v34, %s3534_s1 }
0x25e4   :  { %1511 = vrot.lane.b32.xlu0 %v3740_v58, %s3539_s14  ;;  %v2683_v58 = vld [vmem:[%s4286_s4 + $0x40] sm:$0xff] }
0x25e8   :  { %1513 = vrot.lane.b32.xlu0 %v3785_v40, %s3539_s14  ;;  %v2684_v40 = vld [vmem:[%s4286_s4 + $0x48] sm:$0xff] }
0x25e9   :  { %v3210_v38 = vpack.c.bf16 %v2684_v40, %v2683_v58 }
0x25eb   :  { %3211 = vmatprep.subr.bf16.mxu1 %v3210_v38 }
0x25ec   :  { %1515 = vrot.lane.b32.xlu0 %v3801_v61, %s3539_s14  ;;  %v1577_v61 = vld [vmem:[%s4286_s4 + $0x10] sm:$0xff]  ;;  %3213 = vmatpush3.bf16.msra.mxu1 %v3210_v38 }
0x25ed   :  { %3215 = vmatprep.subr.bf16.mxu1 %v3214_v42 }
0x25f0   :  { %1517 = vrot.lane.b32.xlu0 %v3817_v35, %s3539_s14  ;;  %v1578_v35 = vld [vmem:[%s4286_s4 + $0x18] sm:$0xff]  ;;  %3217 = vmatpush3.bf16.msra.mxu1 %v3214_v42 }
0x25f1   :  { %v3198_v39 = vpack.c.bf16 %v1578_v35, %v1577_v61  ;;  %3219 = vmatprep.subr.bf16.mxu1 %v3218_v33 }
0x25f3   :  { %3199 = vmatprep.subr.bf16.mxu0 %v3198_v39 }
0x25f4   :  { %1519 = vrot.lane.b32.xlu0 %v3833_v54, %s3539_s14  ;;  %v1580_v54 = vld [vmem:[%s4286_s4 + $0x28] sm:$0xff]  ;;  %3201 = vmatpush3.bf16.msra.mxu0 %v3198_v39 }
0x25f5   :  { %v3202_v14 = vpack.c.bf16 %v1580_v54, %v1579_v31  ;;  %3221 = vmatpush3.bf16.msra.mxu1 %v3218_v33 }
0x25f6   :  { %3223 = vmatprep.subr.bf16.mxu1 %v3222_v62 }
0x25f7   :  { %3203 = vmatprep.subr.bf16.mxu0 %v3202_v14 }
0x25f8   :  { %1521 = vrot.lane.b32.xlu0 %v3849_v22, %s3539_s14  ;;  %v914_v22 = vpop.permute.xlu1 %913  ;;  %3205 = vmatpush3.bf16.msra.mxu0 %v3202_v14 }
0x25f9   :  { %v916_v50 = vmul.f32 %v3994_v59, %v914_v22  ;;  %3207 = vmatprep.subr.bf16.mxu0 %v3206_v49  ;;  %3225 = vmatpush3.bf16.msra.mxu1 %v3222_v62 }
0x25fa   :  { %3095 = vmatprep.subr.bf16.mxu1 %v3536_v10 }
0x25fc   :  { %1523 = vrot.lane.b32.xlu0 %v3890_v5, %s3539_s14  ;;  %3209 = vmatpush3.bf16.msra.mxu0 %v3206_v49  ;;  %v1546_v53 = vpop.permute.xlu1 %1545 }
0x25fd   :  { %3087 = vmatprep.subr.bf16.mxu0 %v3536_v10 }
0x2600   :  { %1525 = vrot.lane.b32.xlu0 %v916_v50, %s3539_s14  ;;  %v1548_v56 = vpop.permute.xlu1 %1547 }
0x2604   :  { %v1550_v57 = vpop.permute.xlu1 %1549 }
0x2652   :  { %v1500_v51 = vpop.permute.xlu0 %1499 }
0x2653   :  { %v1502_v29 = vmul.f32 %v4007_v23, %v1500_v51 }
0x2655   :  { %1543 = vrot.lane.b32.xlu1 %v1502_v29, %s3534_s1 }
0x2656   :  { %v1512_v5 = vpop.permute.xlu0 %1511 }
0x2659   :  { %1551 = vrot.lane.b32.xlu1 %v3953_v43, %s3534_s1 }
0x265a   :  { %v1514_v52 = vpop.permute.xlu0 %1513 }
0x265d   :  { %1553 = vrot.lane.b32.xlu1 %v3937_v13, %s3534_s1  ;;  %v1568_v13 = vsel %vm81_vm0, %v1514_v52, %v1546_v53 }
0x265e   :  { %v1516_v55 = vpop.permute.xlu0 %1515 }
0x2661   :  { %1555 = vrot.lane.b32.xlu1 %v3921_v47, %s3534_s1 }
0x2662   :  { %v1518_v2 = vpop.permute.xlu0 %1517 }
0x2663   :  { %v1570_v7 = vsel %vm81_vm0, %v1518_v2, %v1550_v57 }
0x2665   :  { %1557 = vrot.lane.b32.xlu1 %v3895_v15, %s3534_s1  ;;  %v1569_v15 = vsel %vm81_vm0, %v1516_v55, %v1548_v56 }
0x2666   :  { %v1520_v59 = vpop.permute.xlu0 %1519 }
0x266a   :  { %v1522_v47 = vpop.permute.xlu0 %1521 }
0x266e   :  { %v1524_v18 = vpop.permute.xlu0 %1523 }
0x2672   :  { %v1526_v26 = vpop.permute.xlu0 %1525 }
0x26c7   :  { %v1544_v1 = vpop.permute.xlu1 %1543 }
0x26c8   :  { %v1567_v43 = vsel %vm81_vm0, %v1512_v5, %v1544_v1 }
0x26c9   :  { %3047 = vmatprep.mubr.msk.f32.mxu0 %vm1590_vm2, %v1567_v43  ;;  %3075 = vmatprep.mubr.msk.f32.mxu1 %vm1590_vm2, %v1567_v43 }
0x26ca   :  { %3048 = vmatmul.mubr.msk.f32.vlgmr.msra.gmra.mrb[40].mxu0 %vm1590_vm2, %v1568_v13  ;;  %3076 = vmatmul.mubr.msk.f32.vlgmr.msra.gmra.mrb[40].mxu1 %vm1590_vm2, %v1568_v13 }
0x26cb   :  { %v1552_v6 = vpop.permute.xlu1 %1551  ;;  %3050 = vmatprep.mubr.msk.f32.mxu0 %vm1590_vm2, %v1569_v15  ;;  %3078 = vmatprep.mubr.msk.f32.mxu1 %vm1590_vm2, %v1569_v15 }
0x26cc   :  { %3088 = vmatpush3.bf16.msra.mxu0 %v4090_v3  ;;  %3096 = vmatpush3.bf16.msra.mxu1 %v4090_v3  ;;  %v1571_v19 = vsel %vm81_vm0, %v1520_v59, %v1552_v6 }
0x26cd   :  { %3089 = vmatprep.subr.bf16.mxu0 %v3536_v10  ;;  %3097 = vmatprep.subr.bf16.mxu1 %v3536_v10 }
0x26ce   :  { %3051 = vmatmul.mubr.msk.f32.gmra.mrb[42].mxu0 %vm1590_vm2, %v1570_v7  ;;  %3079 = vmatmul.mubr.msk.f32.gmra.mrb[42].mxu1 %vm1590_vm2, %v1570_v7 }
0x26cf   :  { %v1554_v12 = vpop.permute.xlu1 %1553  ;;  %3053 = vmatprep.mubr.msk.f32.mxu0 %vm1590_vm2, %v1571_v19  ;;  %3081 = vmatprep.mubr.msk.f32.mxu1 %vm1590_vm2, %v1571_v19 }
0x26d0   :  { %v1572_v16 = vsel %vm81_vm0, %v1522_v47, %v1554_v12  ;;  %3090 = vmatpush3.bf16.msra.mxu0 %v4101_v8  ;;  %3098 = vmatpush3.bf16.msra.mxu1 %v4101_v8 }
0x26d1   :  { %3103 = vmatprep.subr.bf16.mxu0 %v3536_v10  ;;  %3111 = vmatprep.subr.bf16.mxu1 %v3536_v10 }
0x26d2   :  { %3054 = vmatmul.mubr.msk.f32.gmra.mrb[44].mxu0 %vm1590_vm2, %v1572_v16  ;;  %3082 = vmatmul.mubr.msk.f32.gmra.mrb[44].mxu1 %vm1590_vm2, %v1572_v16 }
0x26d3   :  { %v1556_v27 = vpop.permute.xlu1 %1555 }
0x26d4   :  { %v1573_v25 = vsel %vm81_vm0, %v1524_v18, %v1556_v27 }
0x26d5   :  { %3056 = vmatprep.mubr.msk.f32.mxu0 %vm1590_vm2, %v1573_v25  ;;  %3084 = vmatprep.mubr.msk.f32.mxu1 %vm1590_vm2, %v1573_v25 }
0x26d7   :  { %v1558_v21 = vpop.permute.xlu1 %1557 }
0x26d8   :  { %v1574_v24 = vsel %vm81_vm0, %v1526_v26, %v1558_v21 }
0x26d9   :  { %3057 = vmatmul.mubr.msk.f32.gmra.mrb[46].mxu0 %vm1590_vm2, %v1574_v24  ;;  %3085 = vmatmul.mubr.msk.f32.gmra.mrb[46].mxu1 %vm1590_vm2, %v1574_v24 }
0x26da   :  { %3091 = vmatprep.mubr.msk.bf16.mxu0 %vm3537_vm1, %v3536_v10  ;;  %3099 = vmatprep.mubr.msk.bf16.mxu1 %vm3537_vm1, %v3536_v10 }
0x26dd   :  { %3092 = vmatmul.mubr.bf16.vlgmr.msra.gmra.mrb[48].mxu0 %v3538_v17 }
0x26de   :  { %3104 = vmatpush3.bf16.msra.mxu0 %v4090_v3  ;;  %3107 = vmatprep.mubr.msk.bf16.mxu0 %vm3537_vm1, %v3536_v10 }
0x26df   :  { %3105 = vmatprep.subr.bf16.mxu0 %v3536_v10 }
0x26e2   :  { %3106 = vmatpush3.bf16.msra.mxu0 %v4101_v8 }
0x26e3   :  { %3119 = vmatprep.subr.bf16.mxu0 %v3536_v10 }
0x279d   :  { %v3049_v23 = vpop.f32.mrb[40].mxu0  ;;  %v3077_v30 = vpop.f32.mrb[40].mxu1 }
0x279e   :  { %v1687_v63 = vadd.f32 %v3049_v23, %v2674_v28  ;;  %v1681_v0 = vpop.f32.mrb[41].mxu0  ;;  %v1803_v32 = vpop.f32.mrb[41].mxu1 }
0x279f   :  { %v1682_v14 = vadd.f32 %v2674_v28, %v1681_v0 }
0x27a1   :  { %v3052_v4 = vpop.f32.mrb[42].mxu0  ;;  %v3080_v34 = vpop.f32.mrb[42].mxu1 }
0x27a2   :  { %v4139_v36 = vadd.f32 %v3052_v4, %v2674_v28  ;;  %v1691_v20 = vpop.f32.mrb[43].mxu0  ;;  %v1811_v58 = vpop.f32.mrb[43].mxu1 }
0x27a3   :  { %v4141_v37 = vadd.f32 %v2674_v28, %v1691_v20 }
0x27a5   :  { %v3055_v40 = vpop.f32.mrb[44].mxu0  ;;  %v3083_v61 = vpop.f32.mrb[44].mxu1 }
0x27a6   :  { %v4143_v35 = vadd.f32 %v3055_v40, %v2674_v28  ;;  %v1701_v38 = vpop.f32.mrb[45].mxu0  ;;  %v1819_v39 = vpop.f32.mrb[45].mxu1 }
0x27a7   :  { %v4145_v41 = vadd.f32 %v2674_v28, %v1701_v38 }
0x27ac   :  { %v3058_v9 = vpop.f32.mrb[46].mxu0  ;;  %v4147_v31 = vpop.f32.mrb[46].mxu1 }
0x27ad   :  { %v4149_v42 = vadd.f32 %v3058_v9, %v2674_v28  ;;  %v1711_v54 = vpop.f32.mrb[47].mxu0  ;;  %v1827_v44 = vpop.f32.mrb[47].mxu1 }
0x27ae   :  { %v4151_v45 = vadd.f32 %v2674_v28, %v1711_v54 }
0x27b0   :  { %v1885_v33 = vpop.f32.mrb[48].mxu0 }
0x27b1   :  { %v1891_v46 = vadd.f32 %v1885_v33, %v1682_v14  ;;  %v3093_v48 = vpop.f32.mrb[49].mxu0 }
0x27b2   :  { %v1888_v60 = vpop.f32.mrb[50].mxu0 }
0x27b3   :  { %3386 = vtanh.f32 %v1891_v46  ;;  %v3094_v11 = vpop.f32.mrb[51].mxu0  ;;  %v2703_v49 = vmul.f32 -1.442695, %v1891_v46 }
0x27b5   :  { %3388 = vpow2.f32 %v2703_v49 }
0x27bd   :  { %v3387_v22 = vpop.eup %3386 }
0x27be   :  { %1901 = vrot.lane.b32.xlu0 %v3387_v22, %s3534_s1 }
0x27bf   :  { %v3389_v62 = vpop.eup %3388 }
0x27c0   :  { %v1895_v50 = vadd.f32 1.0, %v3389_v62 }
0x27c2   :  { %3390 = vrcp.f32 %v1895_v50 }
0x27cc   :  { %v3391_v51 = vpop.eup %3390 }
0x27cd   :  { %v1899_v52 = vmul.f32 0.0, %v3391_v51 }
0x2830   :  { %v1902_v29 = vpop.permute.xlu0 %1901 }
0x2831   :  { %v1904_v5 = vmul.f32 %v3391_v51, %v1902_v29 }
0x2833   :  { %1906 = vrot.lane.b32.xlu1 %v1904_v5, %s3539_s14 }
0x28a5   :  { %v1907_v53 = vpop.permute.xlu1 %1906 }
0x28a6   :  { %v1909_v55 = vadd.f32 %v1907_v53, %v1899_v52 }
0x28a8   :  { %3392 = vtanh.f32 %v1909_v55 }
0x28b2   :  { %v3393_v56 = vpop.eup %3392 }
0x28b3   :  { %1912 = vrot.lane.b32.xlu0 %v3393_v56, %s3534_s1 }
0x2925   :  { %v1913_v2 = vpop.permute.xlu0 %1912 }
0x2926   :  { %v1915_v57 = vmul.f32 %v3391_v51, %v1913_v2 }
0x2928   :  { %v1916_v59 = vpack.c.bf16 %v1915_v57, %v1915_v57 }
0x292a   :  { %1918 = vrot.lane.b32.xlu1 %v1916_v59, %s3539_s14 }
0x299c   :  { %v1919_v1 = vpop.permute.xlu1 %1918 }
0x299d   :  { %3100 = vmatmul.mubr.msk.bf16.vlgmr.msra.gmra.mrb[48].mxu1 %vm81_vm0, %v1919_v1 }
0x299e   :  { %3112 = vmatpush3.bf16.msra.mxu1 %v4090_v3  ;;  %3115 = vmatprep.mubr.msk.bf16.mxu1 %vm3537_vm1, %v3536_v10 }
0x299f   :  { %3113 = vmatprep.subr.bf16.mxu1 %v3536_v10 }
0x29a2   :  { %3114 = vmatpush3.bf16.msra.mxu1 %v4101_v8 }
0x29a3   :  { %3127 = vmatprep.subr.bf16.mxu1 %v3536_v10 }
0x2a70   :  { %v1957_v43 = vpop.f32.mrb[48].mxu1 }
0x2a71   :  { %v1963_v13 = vadd.f32 %v1957_v43, %v1687_v63  ;;  %v3101_v15 = vpop.f32.mrb[49].mxu1 }
0x2a72   :  { %v1960_v47 = vpop.f32.mrb[50].mxu1 }
0x2a73   :  { %3394 = vtanh.f32 %v1963_v13  ;;  %v3102_v6 = vpop.f32.mrb[51].mxu1  ;;  %v2705_v19 = vmul.f32 -1.442695, %v1963_v13 }
0x2a75   :  { %3396 = vpow2.f32 %v2705_v19 }
0x2a7d   :  { %v3395_v7 = vpop.eup %3394 }
0x2a7e   :  { %1973 = vrot.lane.b32.xlu0 %v3395_v7, %s3534_s1 }
0x2a7f   :  { %v3397_v12 = vpop.eup %3396 }
0x2a80   :  { %v1967_v16 = vadd.f32 1.0, %v3397_v12 }
0x2a82   :  { %3398 = vrcp.f32 %v1967_v16 }
0x2a8c   :  { %v3399_v18 = vpop.eup %3398 }
0x2a8d   :  { %v1971_v26 = vmul.f32 %v3399_v18, %v1909_v55 }
0x2af0   :  { %v1974_v27 = vpop.permute.xlu0 %1973 }
0x2af1   :  { %v1976_v25 = vmul.f32 %v3399_v18, %v1974_v27 }
0x2af3   :  { %1978 = vrot.lane.b32.xlu1 %v1976_v25, %s3539_s14 }
0x2b65   :  { %v1979_v21 = vpop.permute.xlu1 %1978 }
0x2b66   :  { %v1981_v24 = vadd.f32 %v1979_v21, %v1971_v26 }
0x2b68   :  { %3400 = vtanh.f32 %v1981_v24 }
0x2b72   :  { %v3401_v28 = vpop.eup %3400 }
0x2b73   :  { %1984 = vrot.lane.b32.xlu0 %v3401_v28, %s3534_s1 }
0x2be5   :  { %v1985_v23 = vpop.permute.xlu0 %1984 }
0x2be6   :  { %v1987_v30 = vmul.f32 %v3399_v18, %v1985_v23 }
0x2be8   :  { %v1988_v63 = vpack.c.bf16 %v1987_v30, %v1987_v30 }
0x2bea   :  { %1990 = vrot.lane.b32.xlu1 %v1988_v63, %s3539_s14 }
0x2c5c   :  { %v1991_v0 = vpop.permute.xlu1 %1990 }
0x2c5d   :  { %3108 = vmatmul.mubr.msk.bf16.vlgmr.msra.gmra.mrb[52].mxu0 %vm81_vm0, %v1991_v0 }
0x2c5e   :  { %3120 = vmatpush3.bf16.msra.mxu0 %v4090_v3  ;;  %3123 = vmatprep.mubr.msk.bf16.mxu0 %vm3537_vm1, %v3536_v10 }
0x2c5f   :  { %3121 = vmatprep.subr.bf16.mxu0 %v3536_v10 }
0x2c62   :  { %3122 = vmatpush3.bf16.msra.mxu0 %v4101_v8 }
0x2c63   :  { %3135 = vmatprep.subr.bf16.mxu0 %v3536_v10 }
0x2d30   :  { %v2029_v32 = vpop.f32.mrb[52].mxu0 }
0x2d31   :  { %v2035_v4 = vadd.f32 %v2029_v32, %v4141_v37  ;;  %v3109_v34 = vpop.f32.mrb[53].mxu0 }
0x2d32   :  { %v2032_v20 = vpop.f32.mrb[54].mxu0 }
0x2d33   :  { %3402 = vtanh.f32 %v2035_v4  ;;  %v3110_v58 = vpop.f32.mrb[55].mxu0  ;;  %v2707_v61 = vmul.f32 -1.442695, %v2035_v4 }
0x2d35   :  { %3404 = vpow2.f32 %v2707_v61 }
0x2d3d   :  { %v3403_v40 = vpop.eup %3402 }
0x2d3e   :  { %2045 = vrot.lane.b32.xlu0 %v3403_v40, %s3534_s1 }
0x2d3f   :  { %v3405_v38 = vpop.eup %3404 }
0x2d40   :  { %v2039_v39 = vadd.f32 1.0, %v3405_v38 }
0x2d42   :  { %3406 = vrcp.f32 %v2039_v39 }
0x2d4c   :  { %v3407_v9 = vpop.eup %3406 }
0x2d4d   :  { %v2043_v14 = vmul.f32 %v3407_v9, %v1981_v24 }
0x2db0   :  { %v2046_v54 = vpop.permute.xlu0 %2045 }
0x2db1   :  { %v2048_v44 = vmul.f32 %v3407_v9, %v2046_v54 }
0x2db3   :  { %2050 = vrot.lane.b32.xlu1 %v2048_v44, %s3539_s14 }
0x2e25   :  { %v2051_v33 = vpop.permute.xlu1 %2050 }
0x2e26   :  { %v2053_v37 = vadd.f32 %v2051_v33, %v2043_v14 }
0x2e28   :  { %3408 = vtanh.f32 %v2053_v37 }
0x2e32   :  { %v3409_v46 = vpop.eup %3408 }
0x2e33   :  { %2056 = vrot.lane.b32.xlu0 %v3409_v46, %s3534_s1 }
0x2ea5   :  { %v2057_v48 = vpop.permute.xlu0 %2056 }
0x2ea6   :  { %v2059_v60 = vmul.f32 %v3407_v9, %v2057_v48 }
0x2ea8   :  { %v2060_v11 = vpack.c.bf16 %v2059_v60, %v2059_v60 }
0x2eaa   :  { %2062 = vrot.lane.b32.xlu1 %v2060_v11, %s3539_s14 }
0x2f1c   :  { %v2063_v22 = vpop.permute.xlu1 %2062 }
0x2f1d   :  { %3116 = vmatmul.mubr.msk.bf16.vlgmr.msra.gmra.mrb[52].mxu1 %vm81_vm0, %v2063_v22 }
0x2f1e   :  { %3128 = vmatpush3.bf16.msra.mxu1 %v4090_v3  ;;  %3131 = vmatprep.mubr.msk.bf16.mxu1 %vm3537_vm1, %v3536_v10 }
0x2f1f   :  { %3129 = vmatprep.subr.bf16.mxu1 %v3536_v10 }
0x2f22   :  { %3130 = vmatpush3.bf16.msra.mxu1 %v4101_v8 }
0x2f23   :  { %3143 = vmatprep.subr.bf16.mxu1 %v3536_v10 }
0x2ff0   :  { %v2101_v49 = vpop.f32.mrb[52].mxu1 }
0x2ff1   :  { %v2107_v62 = vadd.f32 %v2101_v49, %v4139_v36  ;;  %v3117_v50 = vpop.f32.mrb[53].mxu1  ;;  %v3256_v49 = vld [vmem:[#allocation5 + $0x10] sm:$0xff]  }
0x2ff2   :  { %v2104_v51 = vpop.f32.mrb[54].mxu1  ;;  %v3257_v50 = vld [vmem:[#allocation5 + $0x18] sm:$0xff]  }
0x2ff3   :  { %3410 = vtanh.f32 %v2107_v62  ;;  %v3118_v29 = vpop.f32.mrb[55].mxu1  ;;  %v2709_v52 = vmul.f32 -1.442695, %v2107_v62 }
0x2ff5   :  { %3412 = vpow2.f32 %v2709_v52 }
0x2ffd   :  { %v3411_v5 = vpop.eup %3410 }
0x2ffe   :  { %2117 = vrot.lane.b32.xlu0 %v3411_v5, %s3534_s1 }
0x2fff   :  { %v3413_v53 = vpop.eup %3412 }
0x3000   :  { %v2111_v55 = vadd.f32 1.0, %v3413_v53 }
0x3002   :  { %3414 = vrcp.f32 %v2111_v55  ;;  %v2692_v55 = vld [vmem:[%s4288_s6 + $0x1] ss:$0 sm:$0xff] }
0x300c   :  { %v3415_v56 = vpop.eup %3414 }
0x300d   :  { %v2115_v59 = vmul.f32 %v3415_v56, %v2053_v37 }
0x3070   :  { %v2118_v2 = vpop.permute.xlu0 %2117 }
0x3071   :  { %v2120_v57 = vmul.f32 %v3415_v56, %v2118_v2 }
0x3073   :  { %2122 = vrot.lane.b32.xlu1 %v2120_v57, %s3539_s14 }
0x30e5   :  { %v2123_v1 = vpop.permute.xlu1 %2122 }
0x30e6   :  { %v2125_v36 = vadd.f32 %v2123_v1, %v2115_v59 }
0x30e8   :  { %3416 = vtanh.f32 %v2125_v36 }
0x30f2   :  { %v3417_v43 = vpop.eup %3416 }
0x30f3   :  { %2128 = vrot.lane.b32.xlu0 %v3417_v43, %s3534_s1 }
0x3165   :  { %v2129_v13 = vpop.permute.xlu0 %2128 }
0x3166   :  { %v2131_v15 = vmul.f32 %v3415_v56, %v2129_v13  ;;  %v1832_v56 = vadd.f32 %v4147_v31, %v2692_v55 }
0x3168   :  { %v2132_v47 = vpack.c.bf16 %v2131_v15, %v2131_v15 }
0x316a   :  { %2134 = vrot.lane.b32.xlu1 %v2132_v47, %s3539_s14 }
0x31dc   :  { %v2135_v6 = vpop.permute.xlu1 %2134 }
0x31dd   :  { %3124 = vmatmul.mubr.msk.bf16.vlgmr.msra.gmra.mrb[56].mxu0 %vm81_vm0, %v2135_v6 }
0x31de   :  { %3136 = vmatpush3.bf16.msra.mxu0 %v4090_v3  ;;  %3139 = vmatprep.mubr.msk.bf16.mxu0 %vm3537_vm1, %v3536_v10 }
0x31df   :  { %3137 = vmatprep.subr.bf16.mxu0 %v3536_v10 }
0x31e2   :  { %3138 = vmatpush3.bf16.msra.mxu0 %v4101_v8 }
0x31e3   :  { %3151 = vmatprep.subr.bf16.mxu0 %v3536_v10 }
0x32b0   :  { %v2173_v7 = vpop.f32.mrb[56].mxu0 }
0x32b1   :  { %v2179_v19 = vadd.f32 %v2173_v7, %v4145_v41  ;;  %v3125_v12 = vpop.f32.mrb[57].mxu0 }
0x32b2   :  { %v2176_v16 = vpop.f32.mrb[58].mxu0 }
0x32b3   :  { %3418 = vtanh.f32 %v2179_v19  ;;  %v3126_v18 = vpop.f32.mrb[59].mxu0  ;;  %v2711_v25 = vmul.f32 -1.442695, %v2179_v19 }
0x32b5   :  { %3420 = vpow2.f32 %v2711_v25 }
0x32bd   :  { %v3419_v27 = vpop.eup %3418 }
0x32be   :  { %2189 = vrot.lane.b32.xlu0 %v3419_v27, %s3534_s1 }
0x32bf   :  { %v3421_v26 = vpop.eup %3420 }
0x32c0   :  { %v2183_v21 = vadd.f32 1.0, %v3421_v26 }
0x32c2   :  { %3422 = vrcp.f32 %v2183_v21 }
0x32cc   :  { %v3423_v24 = vpop.eup %3422 }
0x32cd   :  { %v2187_v30 = vmul.f32 %v3423_v24, %v2125_v36 }
0x3330   :  { %v2190_v28 = vpop.permute.xlu0 %2189 }
0x3331   :  { %v2192_v23 = vmul.f32 %v3423_v24, %v2190_v28 }
0x3333   :  { %2194 = vrot.lane.b32.xlu1 %v2192_v23, %s3539_s14 }
0x33a5   :  { %v2195_v63 = vpop.permute.xlu1 %2194 }
0x33a6   :  { %v2197_v41 = vadd.f32 %v2195_v63, %v2187_v30 }
0x33a8   :  { %3424 = vtanh.f32 %v2197_v41 }
0x33b2   :  { %v3425_v0 = vpop.eup %3424 }
0x33b3   :  { %2200 = vrot.lane.b32.xlu0 %v3425_v0, %s3534_s1 }
0x3425   :  { %v2201_v32 = vpop.permute.xlu0 %2200 }
0x3426   :  { %v2203_v4 = vmul.f32 %v3423_v24, %v2201_v32 }
0x3428   :  { %v2204_v34 = vpack.c.bf16 %v2203_v4, %v2203_v4 }
0x342a   :  { %2206 = vrot.lane.b32.xlu1 %v2204_v34, %s3539_s14 }
0x349c   :  { %v2207_v20 = vpop.permute.xlu1 %2206 }
0x349d   :  { %3132 = vmatmul.mubr.msk.bf16.vlgmr.msra.gmra.mrb[56].mxu1 %vm81_vm0, %v2207_v20 }
0x349e   :  { %3144 = vmatpush3.bf16.msra.mxu1 %v4090_v3  ;;  %3147 = vmatprep.mubr.msk.bf16.mxu1 %vm3537_vm1, %v3536_v10 }
0x349f   :  { %3145 = vmatprep.subr.bf16.mxu1 %v3536_v10 }
0x34a2   :  { %3146 = vmatpush3.bf16.msra.mxu1 %v4101_v8 }
0x3570   :  { %v2245_v58 = vpop.f32.mrb[56].mxu1 }
0x3571   :  { %v2251_v40 = vadd.f32 %v2245_v58, %v4143_v35  ;;  %v3133_v61 = vpop.f32.mrb[57].mxu1 }
0x3572   :  { %v2248_v38 = vpop.f32.mrb[58].mxu1 }
0x3573   :  { %3426 = vtanh.f32 %v2251_v40  ;;  %v3134_v39 = vpop.f32.mrb[59].mxu1  ;;  %v2713_v54 = vmul.f32 -1.442695, %v2251_v40 }
0x3575   :  { %3428 = vpow2.f32 %v2713_v54 }
0x357d   :  { %v3427_v9 = vpop.eup %3426 }
0x357e   :  { %2261 = vrot.lane.b32.xlu0 %v3427_v9, %s3534_s1 }
0x357f   :  { %v3429_v3 = vpop.eup %3428 }
0x3580   :  { %v2255_v44 = vadd.f32 1.0, %v3429_v3 }
0x3582   :  { %3430 = vrcp.f32 %v2255_v44 }
0x358c   :  { %v3431_v14 = vpop.eup %3430 }
0x358d   :  { %v2259_v8 = vmul.f32 %v3431_v14, %v2197_v41 }
0x35f0   :  { %v2262_v33 = vpop.permute.xlu0 %2261 }
0x35f1   :  { %v2264_v37 = vmul.f32 %v3431_v14, %v2262_v33 }
0x35f3   :  { %2266 = vrot.lane.b32.xlu1 %v2264_v37, %s3539_s14 }
0x3665   :  { %v2267_v46 = vpop.permute.xlu1 %2266 }
0x3666   :  { %v2269_v35 = vadd.f32 %v2267_v46, %v2259_v8  ;;  %v2511_v46 = vld [vmem:[%s4289_s7] sm:$0xff] }
0x3668   :  { %3432 = vtanh.f32 %v2269_v35 }
0x3672   :  { %v3433_v48 = vpop.eup %3432 }
0x3673   :  { %2272 = vrot.lane.b32.xlu0 %v3433_v48, %s3534_s1  ;;  %v2513_v48 = vld [vmem:[%s4289_s7 + $0x10] sm:$0xff] }
0x36e5   :  { %v2273_v60 = vpop.permute.xlu0 %2272 }
0x36e6   :  { %v2275_v11 = vmul.f32 %v3431_v14, %v2273_v60  ;;  %v3540_v60 = vmov 0.0|0.0  }
0x36e7   :  { %3226 = vmatprep.subr.bf16.mxu1 %v3540_v60 }
0x36e8   :  { %v2276_v22 = vpack.c.bf16 %v2275_v11, %v2275_v11 }
0x36ea   :  { %2278 = vrot.lane.b32.xlu1 %v2276_v22, %s3539_s14  ;;  %v2514_v22 = vld [vmem:[%s4289_s7 + $0x18] sm:$0xff] }
0x375c   :  { %v2279_v62 = vpop.permute.xlu1 %2278 }
0x375d   :  { %3140 = vmatmul.mubr.msk.bf16.vlgmr.msra.gmra.mrb[60].mxu0 %vm81_vm0, %v2279_v62  ;;  %v2515_v62 = vld [vmem:[%s4289_s7 + $0x20] sm:$0xff] }
0x375e   :  { %3152 = vmatpush3.bf16.msra.mxu0 %v3256_v49  ;;  %3155 = vmatprep.mubr.msk.bf16.mxu0 %vm3537_vm1, %v3536_v10  ;;  %v3230_v49 = vpack.c.bf16 %v2514_v22, %v2513_v48 }
0x375f   :  { %3153 = vmatprep.subr.bf16.mxu0 %v3536_v10 }
0x3762   :  { %3154 = vmatpush3.bf16.msra.mxu0 %v3257_v50  ;;  %v2516_v50 = vld [vmem:[%s4289_s7 + $0x28] sm:$0xff] }
0x3765   :  { %3156 = vmatmul.mubr.bf16.vlgmr.msra.gmra.mrb[64].mxu0 %v3538_v17 }
0x3830   :  { %v2317_v51 = vpop.f32.mrb[60].mxu0 }
0x3831   :  { %v2323_v29 = vadd.f32 %v2317_v51, %v4151_v45  ;;  %v3141_v5 = vpop.f32.mrb[61].mxu0  ;;  %v3233_v51 = vpack.c.bf16 %v2516_v50, %v2515_v62 }
0x3832   :  { %v2320_v52 = vpop.f32.mrb[62].mxu0  ;;  %v2518_v5 = vld [vmem:[%s4289_s7 + $0x38] sm:$0xff] }
0x3833   :  { %3434 = vtanh.f32 %v2323_v29  ;;  %v3142_v53 = vpop.f32.mrb[63].mxu0  ;;  %v2715_v17 = vmul.f32 -1.442695, %v2323_v29  ;;  %v2517_v29 = vld [vmem:[%s4289_s7 + $0x30] sm:$0xff] }
0x3834   :  { %v3236_v53 = vpack.c.bf16 %v2518_v5, %v2517_v29 }
0x3835   :  { %3436 = vpow2.f32 %v2715_v17 }
0x3838   :  { %v2471_v2 = vpop.f32.mrb[64].mxu0 }
0x3839   :  { %v2477_v57 = vadd.f32 %v2471_v2, %v1832_v56  ;;  %v3157_v59 = vpop.f32.mrb[65].mxu0 }
0x383a   :  { %v2474_v1 = vpop.f32.mrb[66].mxu0 }
0x383b   :  { %v3158_v36 = vpop.f32.mrb[67].mxu0  ;;  %v2720_v26 = vmul.f32 -1.442695, %v2477_v57  ;;  %v2721_v1 = vld [vmem:[%s4290_s8] ss:$0 sm:$0xff] }
0x383d   :  { %v3435_v43 = vpop.eup %3434 }
0x383e   :  { %2333 = vrot.lane.b32.xlu0 %v3435_v43, %s3534_s1 }
0x383f   :  { %v3437_v45 = vpop.eup %3436 }
0x3840   :  { %v2327_v13 = vadd.f32 1.0, %v3437_v45 }
0x3842   :  { %3438 = vrcp.f32 %v2327_v13 }
0x384c   :  { %v3439_v15 = vpop.eup %3438 }
0x384d   :  { %v2331_v7 = vmul.f32 %v3439_v15, %v2269_v35  ;;  %v2512_v35 = vld [vmem:[%s4289_s7 + $0x8] sm:$0xff]  ;;  %s3541_s7 = smov [#allocation7]  }
0x384e   :  { %v3227_v11 = vpack.c.bf16 %v2512_v35, %v2511_v46 }
0x38b0   :  { %v2334_v47 = vpop.permute.xlu0 %2333 }
0x38b1   :  { %v2336_v6 = vmul.f32 %v3439_v15, %v2334_v47 }
0x38b3   :  { %2338 = vrot.lane.b32.xlu1 %v2336_v6, %s3539_s14 }
0x3925   :  { %v2339_v31 = vpop.permute.xlu1 %2338 }
0x3926   :  { %v2341_v19 = vadd.f32 %v2339_v31, %v2331_v7 }
0x3928   :  { %3440 = vtanh.f32 %v2341_v19 }
0x3929   :  { %3442 = vtanh.f32 %v2477_v57 }
0x392a   :  { %3444 = vpow2.f32 %v2720_v26 }
0x3932   :  { %v3441_v12 = vpop.eup %3440 }
0x3933   :  { %2344 = vrot.lane.b32.xlu0 %v3441_v12, %s3534_s1  ;;  %v3443_v25 = vpop.eup %3442 }
0x3934   :  { %v3445_v21 = vpop.eup %3444 }
0x3935   :  { %v2481_v24 = vadd.f32 1.0, %v3445_v21 }
0x3937   :  { %3446 = vrcp.f32 %v2481_v24 }
0x3941   :  { %v3447_v23 = vpop.eup %3446 }
0x3942   :  { %v2485_v41 = vmul.f32 0.0, %v3447_v23 }
0x39a5   :  { %v2345_v16 = vpop.permute.xlu0 %2344 }
0x39a6   :  { %v2347_v18 = vmul.f32 %v3439_v15, %v2345_v16 }
0x39a8   :  { %v2348_v27 = vpack.c.bf16 %v2347_v18, %v2347_v18 }
0x39aa   :  { %2350 = vrot.lane.b32.xlu1 %v2348_v27, %s3539_s14 }
0x39ae   :  { %2487 = vrot.lane.b32.xlu1 %v3443_v25, %s3534_s1 }
0x3a1c   :  { %v2351_v28 = vpop.permute.xlu1 %2350 }
0x3a1d   :  { %3148 = vmatmul.mubr.msk.bf16.vlgmr.msra.gmra.mrb[60].mxu1 %vm81_vm0, %v2351_v28 }
0x3a1e   :  { %3175 = vmatprep.mubr.msk.f32.mxu1 %vm3537_vm1, %v3536_v10  ;;  %3228 = vmatpush3.bf16.msra.mxu1 %v3227_v11 }
0x3a1f   :  { %3229 = vmatprep.subr.bf16.mxu1 %v3540_v60 }
0x3a20   :  { %v2488_v30 = vpop.permute.xlu1 %2487 }
0x3a21   :  { %v2490_v63 = vmul.f32 %v3447_v23, %v2488_v30 }
0x3a22   :  { %3231 = vmatpush3.bf16.msra.mxu1 %v3230_v49 }
0x3a23   :  { %2492 = vrot.lane.b32.xlu1 %v2490_v63, %s3539_s14  ;;  %3232 = vmatprep.subr.bf16.mxu1 %v3540_v60 }
0x3a26   :  { %3234 = vmatpush3.bf16.msra.mxu1 %v3233_v51 }
0x3a27   :  { %3235 = vmatprep.subr.bf16.mxu1 %v3540_v60 }
0x3a2a   :  { %3237 = vmatpush3.bf16.msra.mxu1 %v3236_v53 }
0x3a95   :  { %v2493_v0 = vpop.permute.xlu1 %2492 }
0x3a96   :  { %v2495_v32 = vadd.f32 %v2493_v0, %v2485_v41 }
0x3a98   :  { %3448 = vtanh.f32 %v2495_v32 }
0x3aa2   :  { %v3449_v4 = vpop.eup %3448 }
0x3aa3   :  { %2498 = vrot.lane.b32.xlu1 %v3449_v4, %s3534_s1 }
0x3af0   :  { %v2389_v34 = vpop.f32.mrb[60].mxu1 }
0x3af1   :  { %v2395_v20 = vadd.f32 %v2389_v34, %v4149_v42  ;;  %v3149_v58 = vpop.f32.mrb[61].mxu1 }
0x3af2   :  { %v2392_v40 = vpop.f32.mrb[62].mxu1 }
0x3af3   :  { %3450 = vtanh.f32 %v2395_v20  ;;  %v3150_v61 = vpop.f32.mrb[63].mxu1  ;;  %v2717_v9 = vmul.f32 -1.442695, %v2395_v20 }
0x3af5   :  { %3452 = vpow2.f32 %v2717_v9 }
0x3afd   :  { %v3451_v10 = vpop.eup %3450 }
0x3afe   :  { %2405 = vrot.lane.b32.xlu0 %v3451_v10, %s3534_s1 }
0x3aff   :  { %v3453_v54 = vpop.eup %3452 }
0x3b00   :  { %v2399_v3 = vadd.f32 1.0, %v3453_v54 }
0x3b02   :  { %3454 = vrcp.f32 %v2399_v3 }
0x3b0c   :  { %v3455_v44 = vpop.eup %3454 }
0x3b0d   :  { %v2403_v42 = vmul.f32 %v3455_v44, %v2341_v19 }
0x3b15   :  { %v2499_v38 = vpop.permute.xlu1 %2498 }
0x3b16   :  { %v2501_v39 = vmul.f32 %v3447_v23, %v2499_v38 }
0x3b18   :  { %2507 = vrot.lane.b32.xlu1 %v2501_v39, %s3534_s1 }
0x3b70   :  { %v2406_v14 = vpop.permute.xlu0 %2405 }
0x3b71   :  { %v2408_v33 = vmul.f32 %v3455_v44, %v2406_v14 }
0x3b73   :  { %2410 = vrot.lane.b32.xlu0 %v2408_v33, %s3539_s14 }
0x3b8a   :  { %v2508_v2 = vpop.permute.xlu1 %2507 }
0x3be5   :  { %v2411_v37 = vpop.permute.xlu0 %2410 }
0x3be6   :  { %v2413_v8 = vadd.f32 %v2411_v37, %v2403_v42 }
0x3be8   :  { %3456 = vtanh.f32 %v2413_v8 }
0x3bf2   :  { %v3457_v52 = vpop.eup %3456 }
0x3bf3   :  { %2416 = vrot.lane.b32.xlu0 %v3457_v52, %s3534_s1  ;;  %s2607_s1 = sshll.u32 %s3541_s7, 4  ;;  %s2608_s1 = int_to_ptr.vmem [resolvable:$true] %s2607_s1 }
0x3bf4   :  { %s3502_s22 = scalar_lea.vmem %s2608_s1, 128  ;;  %p3507_p3 = scmp.lt.s32.totalorder %s2608_s1, %s2608_s1 }
0x3bf5   :  { %p3503_p2 = scmp.ne.s32.totalorder %s2608_s1, %s3502_s22  ;;  %p3508_p4 = scmp.lt.s32.totalorder %s3502_s22, %s3502_s22 }
0x3bf7   :  { %p3509_p5 = por %p3508_p4, %p3507_p3 }
0x3bf9   :  { %p3510_p6 = pnand %p3509_p5, %p3503_p2 }
0x3c65   :  { %v2417_v55 = vpop.permute.xlu0 %2416 }
0x3c66   :  { %v2419_v56 = vmul.f32 %v3455_v44, %v2417_v55 }
0x3c68   :  { %2503 = vrot.lane.b32.xlu0 %v2419_v56, %s3539_s14 }
0x3cda   :  { %v2504_v57 = vpop.permute.xlu0 %2503 }
0x3cdb   :  { %v2510_v59 = vsel %vm81_vm0, %v2504_v57, %v2508_v2 }
0x3cdc   :  { %3176 = vmatmul.mubr.msk.f32.vlgmr.msra.gmra.mrb[64].mxu1 %vm1590_vm2, %v2510_v59 }
0x3daf   :  { %v2595_v36 = vpop.f32.mrb[64].mxu1 }
0x3db0   :  { %v2596_v43 = vadd.f32 %v2721_v1, %v2595_v36  ;;  %v3177_v17 = vpop.f32.mrb[65].mxu1 }
0x3db2   :  { %2600 = vst.msk [vmem:[#allocation7] sm:$0xff] %vm2599_vm3, %v2596_v43 }
0x3db3   :  { %3513 = shalt.err (!%p3510_p6)
}
0x3db4   :  { %s3514_s24 = scalar_lea.hbm %s4291_s9, 128 }
0x3db5   :  { %p3515_p7 = scmp.ne.s32.totalorder %s4291_s9, %s3514_s24  ;;  %p3518_p8 = scmp.lt.u32.totalorder %s3514_s24, %s4291_s9 }
0x3db7   :  { %p3520_p9 = pnand %p3518_p8, %p3515_p7 }
0x3db9   :  { %3523 = shalt.err (!%p3520_p9)
}
0x3dba   :  { %2610 = dma.vmem_to_hbm [thread:$0]  %s2608_s1, 128, %s4291_s9, [#allocation4]  }
0x3dbb   :  { %3528 = dma.done.wait [#allocation4], 128  }
0x3dbc   :  { %3529 = vsyncadd [#allocation4], 4294967168 }
0x3dbd   :  { %2614 = vsyncpa [#allocation3], 1 }
0x3dbe   :  { %2615 = vsyncpa [#allocation6], 1 }
0x3dbf   :  { %2616 = vsyncpa [#allocation4], 1 }

</bundles_post_ra>
